<compile_context>
chip_gen: v7x
topology: tpu7x:2x2x1
jax: 0.10.0
libtpu: 0.0.40
codegen_flags: <defaults>
</compile_context>

<pallas_src>
import jax
import jax.numpy as jnp
from jax import lax
from jax.experimental import pallas as pl
from jax.experimental.pallas import tpu as pltpu

EPS = 1e-5


# ------------------------------ Pallas kernels ----------------------------- #
def conv_stats_kernel(p_ref, w_ref, y_ref, stats_ref):
    """Conv-as-matmul for one M-tile + partial BN statistics.

    p_ref: (TM, Kp) bf16 patches, w_ref: (Kp, Cp) bf16 weights,
    y_ref: (TM, Cp) f32 conv output, stats_ref: (1, 2, Cp) f32 [sum, sumsq].
    """
    y = jnp.dot(p_ref[...], w_ref[...], preferred_element_type=jnp.float32)
    y_ref[...] = y
    sums = jnp.sum(y, axis=0, keepdims=True)          # (1, Cp)
    sumsq = jnp.sum(y * y, axis=0, keepdims=True)     # (1, Cp)
    stats_ref[...] = jnp.concatenate([sums, sumsq], axis=0).reshape(
        1, 2, y.shape[-1])


def bn_relu_kernel(y_ref, s_ref, t_ref, o_ref):
    """Apply folded BatchNorm affine + ReLU: o = max(y * s + t, 0)."""
    o_ref[...] = jnp.maximum(
        y_ref[...] * s_ref[...] + t_ref[...], 0.0).astype(o_ref.dtype)


# ------------------------------ helpers ------------------------------------ #
def _round_up(x, m):
    return (x + m - 1) // m * m


def _choose_tm(m, kp, cp, budget=12 * 1024 * 1024):
    """Largest M-tile whose double-buffered VMEM footprint fits `budget`.

    Budget is conservative so the kernel fits the *default* scoped-VMEM limit
    on every generation (v5e 16 MiB, v6e/v7x 32 MiB; v7x physical 64 MiB).
    """
    tm = 4096
    while tm > 256:
        conv_pass = 2 * (tm * kp * 2 + tm * cp * 4) + kp * cp * 2
        bn_pass = 2 * (tm * cp * 4 + tm * cp * 4)
        if max(conv_pass, bn_pass) <= budget:
            break
        tm //= 2
    # Don't over-pad tiny problems; keep at least a couple of grid steps.
    while tm > 256 and tm >= m:
        tm //= 2
    return tm


def _im2col(x_nhwc):
    """x: (N, H, W, C) -> (N*H*W, 9*C) patches for a 3x3 SAME conv."""
    n, h, w, c = x_nhwc.shape
    xp = jnp.pad(x_nhwc, ((0, 0), (1, 1), (1, 1), (0, 0)))
    cols = []
    for dy in range(3):
        for dx in range(3):
            cols.append(xp[:, dy:dy + h, dx:dx + w, :])
    patches = jnp.concatenate(cols, axis=-1)            # (N, H, W, 9*C)
    return patches.reshape(n * h * w, 9 * c)


# ------------------------------ one conv layer ------------------------------ #
def _conv_bn_relu(x_nhwc, w_oihw, gamma, beta, *, out_dtype):
    n, h, w, cin = x_nhwc.shape
    cout = w_oihw.shape[0]
    m = n * h * w
    k = 9 * cin
    kp = _round_up(k, 8)          # sublane-friendly contraction dim
    cp = _round_up(cout, 128)     # lane-dense output channels

    tm = _choose_tm(m, kp, cp)
    m_pad = _round_up(m, tm)
    n_tiles = m_pad // tm

    # Layout glue (XLA): im2col in bf16, pad M and K.  Zero-padded rows/cols
    # contribute 0 to the conv output and to the BN partial sums.
    patches = _im2col(x_nhwc.astype(jnp.bfloat16))                  # (m, k)
    patches = jnp.pad(patches, ((0, m_pad - m), (0, kp - k)))       # (m_pad, kp)

    # (Cout, Cin, 3, 3) -> (3, 3, Cin, Cout) -> (9*Cin, Cout); row index is
    # (dy*3 + dx)*Cin + ci, matching the im2col concatenation order above.
    w_mat = jnp.transpose(w_oihw, (2, 3, 1, 0)).reshape(k, cout)
    w_mat = jnp.pad(w_mat, ((0, kp - k), (0, cp - cout))).astype(jnp.bfloat16)

    # NOTE: the conv bias is intentionally NOT applied — a per-channel bias
    # before training-mode BatchNorm cancels exactly in (y - mean).

    # Pass 1: conv matmul + per-tile partial BN statistics.
    y_pad, stats = pl.pallas_call(
        conv_stats_kernel,
        out_shape=(jax.ShapeDtypeStruct((m_pad, cp), jnp.float32),
                   jax.ShapeDtypeStruct((n_tiles, 2, cp), jnp.float32)),
        grid=(n_tiles,),
        in_specs=[
            pl.BlockSpec((tm, kp), lambda i: (i, 0)),
            pl.BlockSpec((kp, cp), lambda i: (0, 0)),   # invariant: fetched once
        ],
        out_specs=(
            pl.BlockSpec((tm, cp), lambda i: (i, 0)),
            pl.BlockSpec((1, 2, cp), lambda i: (i, 0, 0)),
        ),
        compiler_params=pltpu.CompilerParams(
            dimension_semantics=("parallel",)),
        cost_estimate=pl.CostEstimate(
            flops=2 * m_pad * kp * cp,
            transcendentals=0,
            bytes_accessed=(m_pad * kp * 2 + kp * cp * 2
                            + m_pad * cp * 4 + n_tiles * 2 * cp * 4)),
    )(patches, w_mat)

    # Tiny per-channel reduction + affine folding (Cp-sized; plain JAX).
    sums = jnp.sum(stats[:, 0, :], axis=0)
    sumsq = jnp.sum(stats[:, 1, :], axis=0)
    mean = sums / m
    var = jnp.maximum(sumsq / m - mean * mean, 0.0)     # biased batch variance
    gamma_p = jnp.pad(gamma, (0, cp - cout))
    beta_p = jnp.pad(beta, (0, cp - cout))
    s = gamma_p * lax.rsqrt(var + EPS)
    t = beta_p - mean * s

    # Pass 2: folded BN affine + ReLU, tiled over M.
    out_pad = pl.pallas_call(
        bn_relu_kernel,
        out_shape=jax.ShapeDtypeStruct((m_pad, cp), out_dtype),
        grid=(n_tiles,),
        in_specs=[
            pl.BlockSpec((tm, cp), lambda i: (i, 0)),
            pl.BlockSpec((1, cp), lambda i: (0, 0)),
            pl.BlockSpec((1, cp), lambda i: (0, 0)),
        ],
        out_specs=pl.BlockSpec((tm, cp), lambda i: (i, 0)),
        compiler_params=pltpu.CompilerParams(
            dimension_semantics=("parallel",)),
    )(y_pad, s.reshape(1, cp), t.reshape(1, cp))

    return out_pad[:m, :cout].reshape(n, h, w, cout)


def double_conv(x_nchw, params):
    """Forward of DoubleConv.  Input/output are NCHW like PyTorch."""
    x = jnp.transpose(x_nchw, (0, 2, 3, 1))                    # NCHW -> NHWC
    # Layer-1 output kept in bf16: it feeds layer-2's bf16 im2col directly.
    y = _conv_bn_relu(x, params["w1"], params["g1"], params["beta1"],
                      out_dtype=jnp.bfloat16)
    y = _conv_bn_relu(y, params["w2"], params["g2"], params["beta2"],
                      out_dtype=jnp.float32)
    return jnp.transpose(y, (0, 3, 1, 2))                      # NHWC -> NCHW


# ---------------------------- pure-JAX reference ---------------------------- #
def _ref_conv_bn_relu(x_nhwc, w_oihw, b, gamma, beta):
    w_hwio = jnp.transpose(w_oihw, (2, 3, 1, 0))
    y = lax.conv_general_dilated(
        x_nhwc, w_hwio, (1, 1), "SAME",
        dimension_numbers=("NHWC", "HWIO", "NHWC"),
        precision=lax.Precision.HIGHEST) + b
    mean = jnp.mean(y, axis=(0, 1, 2), keepdims=True)
    var = jnp.var(y, axis=(0, 1, 2), keepdims=True)
    return jnp.maximum((y - mean) * lax.rsqrt(var + EPS) * gamma + beta, 0.0)


def double_conv_ref(x_nchw, params):
    x = jnp.transpose(x_nchw, (0, 2, 3, 1))
    y = _ref_conv_bn_relu(x, params["w1"], params["b1"], params["g1"], params["beta1"])
    y = _ref_conv_bn_relu(y, params["w2"], params["b2"], params["g2"], params["beta2"])
    return jnp.transpose(y, (0, 3, 1, 2))


# --------------------------------- main ------------------------------------ #
if __name__ == "__main__":
    N, CIN, COUT, H, W = 2, 4, 8, 16, 16

    key = jax.random.PRNGKey(0)
    ks = jax.random.split(key, 9)

    # Deterministic parameter init (shapes match nn.Conv2d / nn.BatchNorm2d).
    # b1/b2 are only used by the f32 reference: the fused path drops them
    # because a pre-BN per-channel bias cancels in the mean subtraction.
    params = {
        "w1": jax.random.normal(ks[0], (COUT, CIN, 3, 3), jnp.float32)
               / jnp.sqrt(9.0 * CIN),
        "b1": 0.1 * jax.random.normal(ks[1], (COUT,), jnp.float32),
        "g1": 1.0 + 0.1 * jax.random.normal(ks[2], (COUT,), jnp.float32),
        "beta1": 0.1 * jax.random.normal(ks[3], (COUT,), jnp.float32),
        "w2": jax.random.normal(ks[4], (COUT, COUT, 3, 3), jnp.float32)
               / jnp.sqrt(9.0 * COUT),
        "b2": 0.1 * jax.random.normal(ks[5], (COUT,), jnp.float32),
        "g2": 1.0 + 0.1 * jax.random.normal(ks[6], (COUT,), jnp.float32),
        "beta2": 0.1 * jax.random.normal(ks[7], (COUT,), jnp.float32),
    }

    x = jax.random.normal(ks[8], (N, CIN, H, W), jnp.float32)   # NCHW like PyTorch

    out = jax.block_until_ready(jax.jit(double_conv)(x, params))
    ref = jax.block_until_ready(double_conv_ref(x, params))

    assert out.shape == (N, COUT, H, W), out.shape
    assert out.dtype == jnp.float32
    # bf16 MXU inputs with f32 accumulation across two stacked conv layers.
    assert jnp.allclose(out, ref, atol=5e-2, rtol=5e-2), (
        float(jnp.max(jnp.abs(out - ref))))

    print("KERNEL_OK")
</pallas_src>

<mosaic_0001>
module attributes {stable_mosaic.version = 11 : i64} {
  func.func @conv_stats_kernel(%arg0: i32, %arg1: memref<256x40xbf16, #tpu.memory_space<vmem>>, %arg2: memref<40x128xbf16, #tpu.memory_space<vmem>>, %arg3: memref<256x128xf32, #tpu.memory_space<vmem>>, %arg4: memref<1x2x128xf32, #tpu.memory_space<vmem>>) attributes {dimension_semantics = [#tpu.dimension_semantics<parallel>], iteration_bounds = array<i64: 2>, scalar_prefetch = 0 : i64, scratch_operands = 0 : i64, tpu.core_type = #tpu.core_type<tc>, window_params = [{transform_indices = @transform_0, window_bounds = array<i64: 256, 40>}, {pipeline_mode = #tpu.pipeline_mode<synchronous>, transform_indices = @transform_1, window_bounds = array<i64: 40, 128>}, {transform_indices = @transform_2, window_bounds = array<i64: 256, 128>}, {transform_indices = @transform_3, window_bounds = array<i64: 1, 2, 128>}]} {
    %c0 = arith.constant 0 : index
    %c0_0 = arith.constant 0 : index
    %0 = vector.load %arg1[%c0, %c0_0] : memref<256x40xbf16, #tpu.memory_space<vmem>>, vector<256x40xbf16>
    %c0_1 = arith.constant 0 : index
    %c0_2 = arith.constant 0 : index
    %1 = vector.load %arg2[%c0_1, %c0_2] : memref<40x128xbf16, #tpu.memory_space<vmem>>, vector<40x128xbf16>
    %cst = arith.constant dense<0.000000e+00> : vector<256x128xf32>
    %2 = tpu.matmul %0, %1, %cst {dimension_numbers = #tpu.dot_dimension_numbers<[1], [0], [0], [1], [0, 0, 1, 1], [], []>} : vector<256x40xbf16>, vector<40x128xbf16>, vector<256x128xf32> -> vector<256x128xf32>
    %c0_3 = arith.constant 0 : index
    %c0_4 = arith.constant 0 : index
    %3 = vector.load %arg3[%c0_3, %c0_4] : memref<256x128xf32, #tpu.memory_space<vmem>>, vector<256x128xf32>
    tpu.vector_store %arg3[%c0_3, %c0_4], %2 {strides = array<i32>} : memref<256x128xf32, #tpu.memory_space<vmem>>, vector<256x128xf32>,
    %cst_5 = arith.constant dense<0.000000e+00> : vector<128xf32>
    %4 = vector.multi_reduction <add>, %2, %cst_5 [0] : vector<256x128xf32> to vector<128xf32>
    %5 = vector.shape_cast %4 : vector<128xf32> to vector<1x128xf32>
    %6 = arith.mulf %2, %2 : vector<256x128xf32>
    %cst_6 = arith.constant dense<0.000000e+00> : vector<128xf32>
    %7 = vector.multi_reduction <add>, %6, %cst_6 [0] : vector<256x128xf32> to vector<128xf32>
    %8 = vector.shape_cast %7 : vector<128xf32> to vector<1x128xf32>
    %9 = tpu.concatenate %5, %8 in 0 : vector<1x128xf32>, vector<1x128xf32> -> vector<2x128xf32>
    %10 = vector.shape_cast %9 : vector<2x128xf32> to vector<1x2x128xf32>
    %c0_7 = arith.constant 0 : index
    %c0_8 = arith.constant 0 : index
    %c0_9 = arith.constant 0 : index
    %11 = vector.load %arg4[%c0_7, %c0_8, %c0_9] : memref<1x2x128xf32, #tpu.memory_space<vmem>>, vector<1x2x128xf32>
    tpu.vector_store %arg4[%c0_7, %c0_8, %c0_9], %10 {strides = array<i32>} : memref<1x2x128xf32, #tpu.memory_space<vmem>>, vector<1x2x128xf32>,
    return
  }
  func.func @transform_0(%arg0: i32) -> (i32, i32) {
    %c0_i32 = arith.constant 0 : i32
    %c0_i32_0 = arith.constant 0 : i32
    return %arg0, %c0_i32 : i32, i32
  }
  func.func @transform_1(%arg0: i32) -> (i32, i32) {
    %c0_i32 = arith.constant 0 : i32
    %c0_i32_0 = arith.constant 0 : i32
    %c0_i32_1 = arith.constant 0 : i32
    return %c0_i32, %c0_i32_0 : i32, i32
  }
  func.func @transform_2(%arg0: i32) -> (i32, i32) {
    %c0_i32 = arith.constant 0 : i32
    %c0_i32_0 = arith.constant 0 : i32
    return %arg0, %c0_i32 : i32, i32
  }
  func.func @transform_3(%arg0: i32) -> (i32, i32, i32) {
    %c0_i32 = arith.constant 0 : i32
    %c0_i32_0 = arith.constant 0 : i32
    %c0_i32_1 = arith.constant 0 : i32
    return %arg0, %c0_i32, %c0_i32_0 : i32, i32, i32
  }
}

module attributes {stable_mosaic.version = 11 : i64} {
  func.func @bn_relu_kernel(%arg0: i32, %arg1: memref<256x128xf32, #tpu.memory_space<vmem>>, %arg2: memref<1x128xf32, #tpu.memory_space<vmem>>, %arg3: memref<1x128xf32, #tpu.memory_space<vmem>>, %arg4: memref<256x128xbf16, #tpu.memory_space<vmem>>) attributes {dimension_semantics = [#tpu.dimension_semantics<parallel>], iteration_bounds = array<i64: 2>, scalar_prefetch = 0 : i64, scratch_operands = 0 : i64, tpu.core_type = #tpu.core_type<tc>, window_params = [{transform_indices = @transform_0, window_bounds = array<i64: 256, 128>}, {pipeline_mode = #tpu.pipeline_mode<synchronous>, transform_indices = @transform_1, window_bounds = array<i64: 1, 128>}, {pipeline_mode = #tpu.pipeline_mode<synchronous>, transform_indices = @transform_2, window_bounds = array<i64: 1, 128>}, {transform_indices = @transform_3, window_bounds = array<i64: 256, 128>}]} {
    %c0 = arith.constant 0 : index
    %c0_0 = arith.constant 0 : index
    %0 = vector.load %arg1[%c0, %c0_0] : memref<256x128xf32, #tpu.memory_space<vmem>>, vector<256x128xf32>
    %c0_1 = arith.constant 0 : index
    %c0_2 = arith.constant 0 : index
    %1 = vector.load %arg2[%c0_1, %c0_2] : memref<1x128xf32, #tpu.memory_space<vmem>>, vector<1x128xf32>
    %2 = vector.broadcast %1 : vector<1x128xf32> to vector<256x128xf32>
    %3 = arith.mulf %0, %2 : vector<256x128xf32>
    %c0_3 = arith.constant 0 : index
    %c0_4 = arith.constant 0 : index
    %4 = vector.load %arg3[%c0_3, %c0_4] : memref<1x128xf32, #tpu.memory_space<vmem>>, vector<1x128xf32>
    %5 = vector.broadcast %4 : vector<1x128xf32> to vector<256x128xf32>
    %6 = arith.addf %3, %5 : vector<256x128xf32>
    %cst = arith.constant 0.000000e+00 : f32
    %7 = vector.broadcast %cst : f32 to vector<256x128xf32>
    %8 = arith.maximumf %6, %7 : vector<256x128xf32>
    %9 = arith.truncf %8 : vector<256x128xf32> to vector<256x128xbf16>
    %c0_5 = arith.constant 0 : index
    %c0_6 = arith.constant 0 : index
    %10 = vector.load %arg4[%c0_5, %c0_6] : memref<256x128xbf16, #tpu.memory_space<vmem>>, vector<256x128xbf16>
    tpu.vector_store %arg4[%c0_5, %c0_6], %9 {strides = array<i32>} : memref<256x128xbf16, #tpu.memory_space<vmem>>, vector<256x128xbf16>,
    return
  }
  func.func @transform_0(%arg0: i32) -> (i32, i32) {
    %c0_i32 = arith.constant 0 : i32
    %c0_i32_0 = arith.constant 0 : i32
    return %arg0, %c0_i32 : i32, i32
  }
  func.func @transform_1(%arg0: i32) -> (i32, i32) {
    %c0_i32 = arith.constant 0 : i32
    %c0_i32_0 = arith.constant 0 : i32
    %c0_i32_1 = arith.constant 0 : i32
    return %c0_i32, %c0_i32_0 : i32, i32
  }
  func.func @transform_2(%arg0: i32) -> (i32, i32) {
    %c0_i32 = arith.constant 0 : i32
    %c0_i32_0 = arith.constant 0 : i32
    %c0_i32_1 = arith.constant 0 : i32
    return %c0_i32, %c0_i32_0 : i32, i32
  }
  func.func @transform_3(%arg0: i32) -> (i32, i32) {
    %c0_i32 = arith.constant 0 : i32
    %c0_i32_0 = arith.constant 0 : i32
    return %arg0, %c0_i32 : i32, i32
  }
}

module attributes {stable_mosaic.version = 11 : i64} {
  func.func @conv_stats_kernel(%arg0: i32, %arg1: memref<256x72xbf16, #tpu.memory_space<vmem>>, %arg2: memref<72x128xbf16, #tpu.memory_space<vmem>>, %arg3: memref<256x128xf32, #tpu.memory_space<vmem>>, %arg4: memref<1x2x128xf32, #tpu.memory_space<vmem>>) attributes {dimension_semantics = [#tpu.dimension_semantics<parallel>], iteration_bounds = array<i64: 2>, scalar_prefetch = 0 : i64, scratch_operands = 0 : i64, tpu.core_type = #tpu.core_type<tc>, window_params = [{transform_indices = @transform_0, window_bounds = array<i64: 256, 72>}, {pipeline_mode = #tpu.pipeline_mode<synchronous>, transform_indices = @transform_1, window_bounds = array<i64: 72, 128>}, {transform_indices = @transform_2, window_bounds = array<i64: 256, 128>}, {transform_indices = @transform_3, window_bounds = array<i64: 1, 2, 128>}]} {
    %c0 = arith.constant 0 : index
    %c0_0 = arith.constant 0 : index
    %0 = vector.load %arg1[%c0, %c0_0] : memref<256x72xbf16, #tpu.memory_space<vmem>>, vector<256x72xbf16>
    %c0_1 = arith.constant 0 : index
    %c0_2 = arith.constant 0 : index
    %1 = vector.load %arg2[%c0_1, %c0_2] : memref<72x128xbf16, #tpu.memory_space<vmem>>, vector<72x128xbf16>
    %cst = arith.constant dense<0.000000e+00> : vector<256x128xf32>
    %2 = tpu.matmul %0, %1, %cst {dimension_numbers = #tpu.dot_dimension_numbers<[1], [0], [0], [1], [0, 0, 1, 1], [], []>} : vector<256x72xbf16>, vector<72x128xbf16>, vector<256x128xf32> -> vector<256x128xf32>
    %c0_3 = arith.constant 0 : index
    %c0_4 = arith.constant 0 : index
    %3 = vector.load %arg3[%c0_3, %c0_4] : memref<256x128xf32, #tpu.memory_space<vmem>>, vector<256x128xf32>
    tpu.vector_store %arg3[%c0_3, %c0_4], %2 {strides = array<i32>} : memref<256x128xf32, #tpu.memory_space<vmem>>, vector<256x128xf32>,
    %cst_5 = arith.constant dense<0.000000e+00> : vector<128xf32>
    %4 = vector.multi_reduction <add>, %2, %cst_5 [0] : vector<256x128xf32> to vector<128xf32>
    %5 = vector.shape_cast %4 : vector<128xf32> to vector<1x128xf32>
    %6 = arith.mulf %2, %2 : vector<256x128xf32>
    %cst_6 = arith.constant dense<0.000000e+00> : vector<128xf32>
    %7 = vector.multi_reduction <add>, %6, %cst_6 [0] : vector<256x128xf32> to vector<128xf32>
    %8 = vector.shape_cast %7 : vector<128xf32> to vector<1x128xf32>
    %9 = tpu.concatenate %5, %8 in 0 : vector<1x128xf32>, vector<1x128xf32> -> vector<2x128xf32>
    %10 = vector.shape_cast %9 : vector<2x128xf32> to vector<1x2x128xf32>
    %c0_7 = arith.constant 0 : index
    %c0_8 = arith.constant 0 : index
    %c0_9 = arith.constant 0 : index
    %11 = vector.load %arg4[%c0_7, %c0_8, %c0_9] : memref<1x2x128xf32, #tpu.memory_space<vmem>>, vector<1x2x128xf32>
    tpu.vector_store %arg4[%c0_7, %c0_8, %c0_9], %10 {strides = array<i32>} : memref<1x2x128xf32, #tpu.memory_space<vmem>>, vector<1x2x128xf32>,
    return
  }
  func.func @transform_0(%arg0: i32) -> (i32, i32) {
    %c0_i32 = arith.constant 0 : i32
    %c0_i32_0 = arith.constant 0 : i32
    return %arg0, %c0_i32 : i32, i32
  }
  func.func @transform_1(%arg0: i32) -> (i32, i32) {
    %c0_i32 = arith.constant 0 : i32
    %c0_i32_0 = arith.constant 0 : i32
    %c0_i32_1 = arith.constant 0 : i32
    return %c0_i32, %c0_i32_0 : i32, i32
  }
  func.func @transform_2(%arg0: i32) -> (i32, i32) {
    %c0_i32 = arith.constant 0 : i32
    %c0_i32_0 = arith.constant 0 : i32
    return %arg0, %c0_i32 : i32, i32
  }
  func.func @transform_3(%arg0: i32) -> (i32, i32, i32) {
    %c0_i32 = arith.constant 0 : i32
    %c0_i32_0 = arith.constant 0 : i32
    %c0_i32_1 = arith.constant 0 : i32
    return %arg0, %c0_i32, %c0_i32_0 : i32, i32, i32
  }
}

module attributes {stable_mosaic.version = 11 : i64} {
  func.func @bn_relu_kernel(%arg0: i32, %arg1: memref<256x128xf32, #tpu.memory_space<vmem>>, %arg2: memref<1x128xf32, #tpu.memory_space<vmem>>, %arg3: memref<1x128xf32, #tpu.memory_space<vmem>>, %arg4: memref<256x128xf32, #tpu.memory_space<vmem>>) attributes {dimension_semantics = [#tpu.dimension_semantics<parallel>], iteration_bounds = array<i64: 2>, scalar_prefetch = 0 : i64, scratch_operands = 0 : i64, tpu.core_type = #tpu.core_type<tc>, window_params = [{transform_indices = @transform_0, window_bounds = array<i64: 256, 128>}, {pipeline_mode = #tpu.pipeline_mode<synchronous>, transform_indices = @transform_1, window_bounds = array<i64: 1, 128>}, {pipeline_mode = #tpu.pipeline_mode<synchronous>, transform_indices = @transform_2, window_bounds = array<i64: 1, 128>}, {transform_indices = @transform_3, window_bounds = array<i64: 256, 128>}]} {
    %c0 = arith.constant 0 : index
    %c0_0 = arith.constant 0 : index
    %0 = vector.load %arg1[%c0, %c0_0] : memref<256x128xf32, #tpu.memory_space<vmem>>, vector<256x128xf32>
    %c0_1 = arith.constant 0 : index
    %c0_2 = arith.constant 0 : index
    %1 = vector.load %arg2[%c0_1, %c0_2] : memref<1x128xf32, #tpu.memory_space<vmem>>, vector<1x128xf32>
    %2 = vector.broadcast %1 : vector<1x128xf32> to vector<256x128xf32>
    %3 = arith.mulf %0, %2 : vector<256x128xf32>
    %c0_3 = arith.constant 0 : index
    %c0_4 = arith.constant 0 : index
    %4 = vector.load %arg3[%c0_3, %c0_4] : memref<1x128xf32, #tpu.memory_space<vmem>>, vector<1x128xf32>
    %5 = vector.broadcast %4 : vector<1x128xf32> to vector<256x128xf32>
    %6 = arith.addf %3, %5 : vector<256x128xf32>
    %cst = arith.constant 0.000000e+00 : f32
    %7 = vector.broadcast %cst : f32 to vector<256x128xf32>
    %8 = arith.maximumf %6, %7 : vector<256x128xf32>
    %c0_5 = arith.constant 0 : index
    %c0_6 = arith.constant 0 : index
    %9 = vector.load %arg4[%c0_5, %c0_6] : memref<256x128xf32, #tpu.memory_space<vmem>>, vector<256x128xf32>
    tpu.vector_store %arg4[%c0_5, %c0_6], %8 {strides = array<i32>} : memref<256x128xf32, #tpu.memory_space<vmem>>, vector<256x128xf32>,
    return
  }
  func.func @transform_0(%arg0: i32) -> (i32, i32) {
    %c0_i32 = arith.constant 0 : i32
    %c0_i32_0 = arith.constant 0 : i32
    return %arg0, %c0_i32 : i32, i32
  }
  func.func @transform_1(%arg0: i32) -> (i32, i32) {
    %c0_i32 = arith.constant 0 : i32
    %c0_i32_0 = arith.constant 0 : i32
    %c0_i32_1 = arith.constant 0 : i32
    return %c0_i32, %c0_i32_0 : i32, i32
  }
  func.func @transform_2(%arg0: i32) -> (i32, i32) {
    %c0_i32 = arith.constant 0 : i32
    %c0_i32_0 = arith.constant 0 : i32
    %c0_i32_1 = arith.constant 0 : i32
    return %c0_i32, %c0_i32_0 : i32, i32
  }
  func.func @transform_3(%arg0: i32) -> (i32, i32) {
    %c0_i32 = arith.constant 0 : i32
    %c0_i32_0 = arith.constant 0 : i32
    return %arg0, %c0_i32 : i32, i32
  }
}

</mosaic_0001>

<bundles_post_ra>
// kernel: double_conv.5
= control target key start
LH: loop header
LB: loop body
LE: loop exit
PB: predicated region body
PF: predicated region fallthrough
CT: control target
= control target key end

     0   :  { %s740_s12 = smov 0   ;;  %s887_s0 = inlined_call_operand.vmem [shape: f32[512,128], index: 0, kind: input, shape index: {}]   ;;  %s888_s1 = inlined_call_operand.vmem [shape: f32[1,128], index: 1, kind: input, shape index: {}]   ;;  %s889_s2 = inlined_call_operand.vmem [shape: f32[1,128], index: 2, kind: input, shape index: {}]   ;;  %s890_s3 = inlined_call_operand.vmem [shape: bf16[512,128], index: 3, kind: output, shape index: {}]  }
   0x1 LB: > { %s532_s13 = sadd.s32 4294967295, %s718_s12   ;;  %p536_p0 = scmp.ge.s32.totalorder %s718_s12, 1  ;;  %s718_s12 = sphi %s740_s12, %s13_s12  }
   0x2   : > { %p138_p1 = scmp.lt.s32.totalorder %s718_s12, 3 }
   0x4   : > { %p139_p2 = pnand %p536_p0, %p138_p1 }
   0x5   : > { %s537_s14 = sshll.u32 (!%p139_p2), %s532_s13, 5  ;;  %v754_v0 = vld [vmem:[%s888_s1] ss:$0 sm:$0xff] (!%p139_p2) }
   0x6   : > { %142 = sbr.rel (%p139_p2) target bundleno = 51 (0x33), region = 32  ;;  %p163_p3 = scmp.lt.s32.totalorder (!%p139_p2), %s537_s14, 63  ;;  %v764_v1 = vld [vmem:[%s889_s2] ss:$0 sm:$0xff] (!%p139_p2) }
   0xd   : > { %s892_s14 = smov (!%p163_p3, %s537_s14), 63 }
   0xe   : > { %s538_s15 = sshll.u32 %s892_s14, 3  ;;  %s540_s23 = sshll.u32 %s892_s14, 2 }
   0xf   : > { %s759_s20 = scalar_lea.vmem %s887_s0, %s538_s15  ;;  %s796_s26 = scalar_lea.vmem %s890_s3, %s540_s23 }
  0x10   : > { %v174_v2 = vld [vmem:[%s759_s20] sm:$0xff]  ;;  %v175_v3 = vld [vmem:[%s759_s20 + $0x8] sm:$0xff]  ;;  %v176_v4 = vld [vmem:[%s759_s20 + $0x10] sm:$0xff] }
  0x11   : > { %v213_v5 = vmul.f32 %v754_v0, %v174_v2  ;;  %v214_v6 = vmul.f32 %v754_v0, %v175_v3  ;;  %v177_v7 = vld [vmem:[%s759_s20 + $0x18] sm:$0xff]  ;;  %v215_v8 = vmul.f32 %v754_v0, %v176_v4  ;;  %v178_v9 = vld [vmem:[%s759_s20 + $0x20] sm:$0xff]  ;;  %v179_v10 = vld [vmem:[%s759_s20 + $0x28] sm:$0xff] }
  0x12   : > { %v216_v11 = vmul.f32 %v754_v0, %v177_v7  ;;  %v217_v12 = vmul.f32 %v754_v0, %v178_v9  ;;  %v218_v13 = vmul.f32 %v754_v0, %v179_v10  ;;  %v180_v14 = vld [vmem:[%s759_s20 + $0x30] sm:$0xff]  ;;  %v181_v15 = vld [vmem:[%s759_s20 + $0x38] sm:$0xff]  ;;  %v182_v24 = vld [vmem:[%s759_s20 + $0x40] sm:$0xff] }
  0x13   : > { %v252_v16 = vadd.f32 %v764_v1, %v213_v5  ;;  %v253_v17 = vadd.f32 %v764_v1, %v214_v6  ;;  %v254_v18 = vadd.f32 %v764_v1, %v215_v8  ;;  %v219_v19 = vmul.f32 %v754_v0, %v180_v14  ;;  %v183_v25 = vld [vmem:[%s759_s20 + $0x48] sm:$0xff]  ;;  %v184_v30 = vld [vmem:[%s759_s20 + $0x50] sm:$0xff]  ;;  %v185_v35 = vld [vmem:[%s759_s20 + $0x58] sm:$0xff] }
  0x14   : > { %v255_v20 = vadd.f32 %v764_v1, %v216_v11  ;;  %v256_v21 = vadd.f32 %v764_v1, %v217_v12  ;;  %v257_v22 = vadd.f32 %v764_v1, %v218_v13  ;;  %v220_v23 = vmul.f32 %v754_v0, %v181_v15  ;;  %v186_v36 = vld [vmem:[%s759_s20 + $0x60] sm:$0xff]  ;;  %v187_v41 = vld [vmem:[%s759_s20 + $0x68] sm:$0xff]  ;;  %v188_v42 = vld [vmem:[%s759_s20 + $0x70] sm:$0xff] }
  0x15   : > { %v284_v26 = vmax.f32 %v252_v16, 0.0  ;;  %v285_v27 = vmax.f32 %v253_v17, 0.0  ;;  %v286_v28 = vmax.f32 %v254_v18, 0.0  ;;  %v258_v29 = vadd.f32 %v764_v1, %v219_v19  ;;  %v189_v51 = vld [vmem:[%s759_s20 + $0x78] sm:$0xff]  ;;  %v190_v56 = vld [vmem:[%s759_s20 + $0x80] sm:$0xff]  ;;  %v191_v61 = vld [vmem:[%s759_s20 + $0x88] sm:$0xff] }
  0x16   : > { %v287_v31 = vmax.f32 %v255_v20, 0.0  ;;  %v288_v32 = vmax.f32 %v256_v21, 0.0  ;;  %v289_v33 = vmax.f32 %v257_v22, 0.0  ;;  %v259_v34 = vadd.f32 %v764_v1, %v220_v23  ;;  %v192_v4 = vld [vmem:[%s759_s20 + $0x90] sm:$0xff]  ;;  %v193_v5 = vld [vmem:[%s759_s20 + $0x98] sm:$0xff]  ;;  %v194_v10 = vld [vmem:[%s759_s20 + $0xa0] sm:$0xff] }
  0x17   : > { %v612_v37 = vpack.c.bf16 %v285_v27, %v284_v26  ;;  %v290_v38 = vmax.f32 %v258_v29, 0.0  ;;  %v221_v39 = vmul.f32 %v754_v0, %v182_v24  ;;  %v222_v40 = vmul.f32 %v754_v0, %v183_v25  ;;  %v195_v15 = vld [vmem:[%s759_s20 + $0xa8] sm:$0xff]  ;;  %v196_v20 = vld [vmem:[%s759_s20 + $0xb0] sm:$0xff]  ;;  %v197_v25 = vld [vmem:[%s759_s20 + $0xb8] sm:$0xff] }
  0x18   : > { %v617_v43 = vpack.c.bf16 %v287_v31, %v286_v28  ;;  %v622_v44 = vpack.c.bf16 %v289_v33, %v288_v32  ;;  %v291_v45 = vmax.f32 %v259_v34, 0.0  ;;  %v223_v46 = vmul.f32 %v754_v0, %v184_v30  ;;  %v198_v30 = vld [vmem:[%s759_s20 + $0xc0] sm:$0xff] }
  0x19   : > { %613 = vst [vmem:[%s796_s26] sm:$0xff] %v612_v37   ;;  %v260_v47 = vadd.f32 %v764_v1, %v221_v39  ;;  %v261_v48 = vadd.f32 %v764_v1, %v222_v40  ;;  %v224_v49 = vmul.f32 %v754_v0, %v185_v35  ;;  %v225_v50 = vmul.f32 %v754_v0, %v186_v36  ;;  %v199_v35 = vld [vmem:[%s759_s20 + $0xc8] sm:$0xff]  ;;  %v200_v40 = vld [vmem:[%s759_s20 + $0xd0] sm:$0xff] }
  0x1a   : > { %689 = vst [vmem:[%s796_s26 + $0x8] sm:$0xff] %v617_v43   ;;  %690 = vst [vmem:[%s796_s26 + $0x10] sm:$0xff] %v622_v44   ;;  %v627_v52 = vpack.c.bf16 %v291_v45, %v290_v38  ;;  %v262_v53 = vadd.f32 %v764_v1, %v223_v46  ;;  %v226_v54 = vmul.f32 %v754_v0, %v187_v41  ;;  %v201_v41 = vld [vmem:[%s759_s20 + $0xd8] sm:$0xff]  ;;  %v202_v46 = vld [vmem:[%s759_s20 + $0xe0] sm:$0xff] }
  0x1b   : > { %v227_v55 = vmul.f32 %v754_v0, %v188_v42  ;;  %v292_v57 = vmax.f32 %v260_v47, 0.0  ;;  %v293_v58 = vmax.f32 %v261_v48, 0.0  ;;  %v263_v59 = vadd.f32 %v764_v1, %v224_v49 }
  0x1c   : > { %v264_v60 = vadd.f32 %v764_v1, %v225_v50  ;;  %691 = vst [vmem:[%s796_s26 + $0x18] sm:$0xff] %v627_v52   ;;  %v294_v62 = vmax.f32 %v262_v53, 0.0  ;;  %v265_v63 = vadd.f32 %v764_v1, %v226_v54  ;;  %v228_v2 = vmul.f32 %v754_v0, %v189_v51  ;;  %v203_v51 = vld [vmem:[%s759_s20 + $0xe8] sm:$0xff] }
  0x1d   : > { %v266_v3 = vadd.f32 %v764_v1, %v227_v55  ;;  %v632_v6 = vpack.c.bf16 %v293_v58, %v292_v57  ;;  %v295_v7 = vmax.f32 %v263_v59, 0.0  ;;  %v229_v9 = vmul.f32 %v754_v0, %v190_v56  ;;  %v204_v56 = vld [vmem:[%s759_s20 + $0xf0] sm:$0xff] }
  0x1e   : > { %v296_v8 = vmax.f32 %v264_v60, 0.0  ;;  %v297_v11 = vmax.f32 %v265_v63, 0.0  ;;  %v267_v12 = vadd.f32 %v764_v1, %v228_v2  ;;  %v230_v14 = vmul.f32 %v754_v0, %v191_v61  ;;  %v205_v61 = vld [vmem:[%s759_s20 + $0xf8] sm:$0xff] }
  0x1f   : > { %v298_v13 = vmax.f32 %v266_v3, 0.0  ;;  %692 = vst [vmem:[%s796_s26 + $0x20] sm:$0xff] %v632_v6   ;;  %v637_v16 = vpack.c.bf16 %v295_v7, %v294_v62  ;;  %v268_v17 = vadd.f32 %v764_v1, %v229_v9  ;;  %v231_v18 = vmul.f32 %v754_v0, %v192_v4 }
  0x20   : > { %v232_v19 = vmul.f32 %v754_v0, %v193_v5  ;;  %v642_v21 = vpack.c.bf16 %v297_v11, %v296_v8  ;;  %v299_v22 = vmax.f32 %v267_v12, 0.0  ;;  %v269_v23 = vadd.f32 %v764_v1, %v230_v14 }
  0x21   : > { %v233_v24 = vmul.f32 %v754_v0, %v194_v10  ;;  %693 = vst [vmem:[%s796_s26 + $0x28] sm:$0xff] %v637_v16   ;;  %v300_v26 = vmax.f32 %v268_v17, 0.0  ;;  %v270_v27 = vadd.f32 %v764_v1, %v231_v18  ;;  %v234_v29 = vmul.f32 %v754_v0, %v195_v15 }
  0x22   : > { %v271_v28 = vadd.f32 %v764_v1, %v232_v19  ;;  %694 = vst [vmem:[%s796_s26 + $0x30] sm:$0xff] %v642_v21   ;;  %v647_v31 = vpack.c.bf16 %v299_v22, %v298_v13  ;;  %v301_v32 = vmax.f32 %v269_v23, 0.0  ;;  %v235_v34 = vmul.f32 %v754_v0, %v196_v20 }
  0x23   : > { %v272_v33 = vadd.f32 %v764_v1, %v233_v24  ;;  %v302_v36 = vmax.f32 %v270_v27, 0.0  ;;  %v273_v38 = vadd.f32 %v764_v1, %v234_v29  ;;  %v236_v39 = vmul.f32 %v754_v0, %v197_v25 }
  0x24   : > { %v303_v37 = vmax.f32 %v271_v28, 0.0  ;;  %695 = vst [vmem:[%s796_s26 + $0x38] sm:$0xff] %v647_v31   ;;  %v652_v42 = vpack.c.bf16 %v301_v32, %v300_v26  ;;  %v274_v44 = vadd.f32 %v764_v1, %v235_v34  ;;  %v237_v45 = vmul.f32 %v754_v0, %v198_v30 }
  0x25   : > { %v304_v43 = vmax.f32 %v272_v33, 0.0  ;;  %v305_v48 = vmax.f32 %v273_v38, 0.0  ;;  %v275_v49 = vadd.f32 %v764_v1, %v236_v39  ;;  %v238_v50 = vmul.f32 %v754_v0, %v199_v35 }
  0x26   : > { %v657_v47 = vpack.c.bf16 %v303_v37, %v302_v36  ;;  %696 = vst [vmem:[%s796_s26 + $0x40] sm:$0xff] %v652_v42   ;;  %v306_v52 = vmax.f32 %v274_v44, 0.0  ;;  %v276_v53 = vadd.f32 %v764_v1, %v237_v45  ;;  %v239_v54 = vmul.f32 %v754_v0, %v200_v40 }
  0x27   : > { %v240_v55 = vmul.f32 %v754_v0, %v201_v41  ;;  %v662_v57 = vpack.c.bf16 %v305_v48, %v304_v43  ;;  %v307_v58 = vmax.f32 %v275_v49, 0.0  ;;  %v277_v59 = vadd.f32 %v764_v1, %v238_v50 }
  0x28   : > { %697 = vst [vmem:[%s796_s26 + $0x48] sm:$0xff] %v657_v47   ;;  %v241_v60 = vmul.f32 %v754_v0, %v202_v46  ;;  %v308_v62 = vmax.f32 %v276_v53, 0.0  ;;  %v278_v63 = vadd.f32 %v764_v1, %v239_v54  ;;  %v242_v3 = vmul.f32 %v754_v0, %v203_v51 }
  0x29   : > { %v279_v2 = vadd.f32 %v764_v1, %v240_v55  ;;  %698 = vst [vmem:[%s796_s26 + $0x50] sm:$0xff] %v662_v57   ;;  %v667_v4 = vpack.c.bf16 %v307_v58, %v306_v52  ;;  %v309_v5 = vmax.f32 %v277_v59, 0.0  ;;  %v243_v7 = vmul.f32 %v754_v0, %v204_v56 }
  0x2a   : > { %v280_v6 = vadd.f32 %v764_v1, %v241_v60  ;;  %v310_v8 = vmax.f32 %v278_v63, 0.0  ;;  %v281_v10 = vadd.f32 %v764_v1, %v242_v3  ;;  %v244_v11 = vmul.f32 %v754_v0, %v205_v61 }
  0x2b   : > { %v311_v9 = vmax.f32 %v279_v2, 0.0  ;;  %699 = vst [vmem:[%s796_s26 + $0x58] sm:$0xff] %v667_v4   ;;  %v672_v12 = vpack.c.bf16 %v309_v5, %v308_v62  ;;  %v282_v14 = vadd.f32 %v764_v1, %v243_v7 }
  0x2c   : > { %v312_v13 = vmax.f32 %v280_v6, 0.0  ;;  %v313_v16 = vmax.f32 %v281_v10, 0.0  ;;  %v283_v17 = vadd.f32 %v764_v1, %v244_v11 }
  0x2d   : > { %v677_v15 = vpack.c.bf16 %v311_v9, %v310_v8  ;;  %700 = vst [vmem:[%s796_s26 + $0x60] sm:$0xff] %v672_v12   ;;  %v314_v18 = vmax.f32 %v282_v14, 0.0 }
  0x2e   : > { %v682_v19 = vpack.c.bf16 %v313_v16, %v312_v13  ;;  %v315_v20 = vmax.f32 %v283_v17, 0.0 }
  0x2f   : > { %701 = vst [vmem:[%s796_s26 + $0x68] sm:$0xff] %v677_v15  }
  0x30   : > { %702 = vst [vmem:[%s796_s26 + $0x70] sm:$0xff] %v682_v19   ;;  %v687_v21 = vpack.c.bf16 %v315_v20, %v314_v18 }
  0x32   : > { %703 = vst [vmem:[%s796_s26 + $0x78] sm:$0xff] %v687_v21  }
  0x33 PF: > { %s13_s12 = sadd.s32 1, %s718_s12  }
  0x34   : > { %p10_p4 = scmp.ge.s32.totalorder %s13_s12, 4  }
  0x36   :  { %12 = sbr.rel (!%p10_p4) target bundleno = 1 (0x1), region = 62 }

// kernel: double_conv.4
= control target key start
LH: loop header
LB: loop body
LE: loop exit
PB: predicated region body
PF: predicated region fallthrough
CT: control target
= control target key end

     0   :  { %s927_s12 = smov 0   ;;  %s1093_s0 = inlined_call_operand.vmem [shape: bf16[512,40], index: 0, kind: input, shape index: {}]   ;;  %s1094_s1 = inlined_call_operand.vmem [shape: bf16[40,128], index: 1, kind: input, shape index: {}]   ;;  %s1095_s2 = inlined_call_operand.vmem [shape: f32[512,128], index: 2, kind: output, shape index: {0}]   ;;  %s1096_s3 = inlined_call_operand.vmem [shape: f32[2,2,128], index: 3, kind: output, shape index: {1}]  }
   0x1 LB: > { %s933_s13 = sadd.s32 4294967295, %s905_s12   ;;  %p764_p0 = scmp.ge.s32.totalorder %s905_s12, 1  ;;  %s905_s12 = sphi %s927_s12, %s14_s12  }
   0x2   : > { %p141_p1 = scmp.lt.s32.totalorder %s905_s12, 3 }
   0x4   : > { %p142_p2 = pnand %p764_p0, %p141_p1 }
   0x5   : > { %v880_v0 = vld [vmem:[%s1094_s1] sm:$0xff] (!%p142_p2)   ;;  %v881_v1 = vld [vmem:[%s1094_s1 + $0x8] sm:$0xff] (!%p142_p2)   ;;  %s765_s18 = sshll.u32 (!%p142_p2), %s933_s13, 5  ;;  %v882_v2 = vld [vmem:[%s1094_s1 + $0x10] ss:$0 sps:$4 sm:$0xff] (!%p142_p2)   ;;  %vm367_vm0 = vcmask (!%p142_p2), 1043456  }
   0x6   : > { %145 = sbr.rel (%p142_p2) target bundleno = 311 (0x137), region = 28  ;;  %826 = vmatprep.subr.bf16.mxu0 (!%p142_p2), %v880_v0  ;;  %p170_p3 = scmp.lt.s32.totalorder (!%p142_p2), %s765_s18, 63  ;;  %864 = vmatprep.subr.bf16.mxu1 (!%p142_p2), %v880_v0  ;;  %vm318_vm1 = vcmask (!%p142_p2), 326656   ;;  %v369_v3 = vsel (!%p142_p2), %vm367_vm0, %v882_v2, 0  ;;  %vm670_vm2 = vcmask (!%p142_p2), 1040384  }
   0x7   : > { %827 = vmatpush3.bf16.msra.mxu0 (!%p142_p2), %v880_v0  ;;  %867 = vmatpush3.bf16.msra.mxu1 (!%p142_p2), %v880_v0  ;;  %p181_p4 = scmp.lt.s32.totalorder (!%p142_p2), %s933_s13, 1 }
   0x8   : > { %828 = vmatprep.subr.bf16.mxu0 (!%p142_p2), %v881_v1  ;;  %865 = vmatprep.subr.bf16.mxu1 (!%p142_p2), %v881_v1 }
   0xb   : > { %829 = vmatpush3.bf16.msra.mxu0 (!%p142_p2), %v881_v1  ;;  %868 = vmatpush3.bf16.msra.mxu1 (!%p142_p2), %v881_v1 }
   0xc   : > { %870 = vmatprep.subr.msk.bf16.mxu0 (!%p142_p2), %vm367_vm0, %v882_v2  ;;  %871 = vmatprep.subr.msk.bf16.mxu1 (!%p142_p2), %vm367_vm0, %v882_v2 }
   0xd   : > { %s1098_s18 = smov (!%p170_p3, %s765_s18), 63  ;;  %s1100_s13 = smov (!%p181_p4, %s933_s13), 1 }
   0xe   : > { %s766_s21 = sshll.u32 %s1098_s18, 2  ;;  %s768_s25 = sshll.u32 %s1098_s18, 3 }
   0xf   : > { %s953_s24 = scalar_lea.vmem %s1093_s0, %s766_s21  ;;  %831 = vmatpush3.bf16.msra.mxu0 %v369_v3  ;;  %869 = vmatpush3.bf16.msra.mxu1 %v369_v3  ;;  %s991_s28 = scalar_lea.vmem %s1095_s2, %s768_s25 }
  0x10   : > { %v883_v4 = vld [vmem:[%s953_s24] sm:$0xff]   ;;  %v884_v5 = vld [vmem:[%s953_s24 + $0x8] sm:$0xff]   ;;  %v885_v6 = vld [vmem:[%s953_s24 + $0x10] sm:$0xff]   ;;  %s769_s29 = sshll.u32 %s1100_s13, 1 }
  0x11   : > { %832 = vmatprep.mubr.msk.bf16.mxu0 %vm318_vm1, %v883_v4  ;;  %v886_v7 = vld [vmem:[%s953_s24 + $0x18] sm:$0xff]   ;;  %v891_v8 = vld [vmem:[%s953_s24 + $0x40] sm:$0xff]   ;;  %v892_v9 = vld [vmem:[%s953_s24 + $0x48] sm:$0xff]   ;;  %s184_s5 = scalar_lea.vmem %s1096_s3, %s769_s29 }
  0x12   : > { %833 = vmatmul.mubr.msk.bf16.vlgmr.msra.gmra.mrb[0].mxu0 %vm318_vm1, %v884_v5  ;;  %848 = vmatprep.mubr.msk.bf16.mxu1 %vm318_vm1, %v891_v8  ;;  %v893_v10 = vld [vmem:[%s953_s24 + $0x50] sm:$0xff]   ;;  %v887_v11 = vld [vmem:[%s953_s24 + $0x20] sm:$0xff]   ;;  %v894_v12 = vld [vmem:[%s953_s24 + $0x58] sm:$0xff]  }
  0x13   : > { %836 = vmatprep.mubr.msk.bf16.mxu0 %vm318_vm1, %v885_v6  ;;  %849 = vmatmul.mubr.msk.bf16.vlgmr.msra.gmra.mrb[0].mxu1 %vm318_vm1, %v892_v9  ;;  %v895_v13 = vld [vmem:[%s953_s24 + $0x60] sm:$0xff]   ;;  %v888_v14 = vld [vmem:[%s953_s24 + $0x28] sm:$0xff]   ;;  %v889_v15 = vld [vmem:[%s953_s24 + $0x30] sm:$0xff]  }
  0x14   : > { %852 = vmatprep.mubr.msk.bf16.mxu1 %vm318_vm1, %v893_v10  ;;  %v896_v16 = vld [vmem:[%s953_s24 + $0x68] sm:$0xff]   ;;  %v897_v17 = vld [vmem:[%s953_s24 + $0x70] sm:$0xff]   ;;  %v890_v18 = vld [vmem:[%s953_s24 + $0x38] sm:$0xff]  }
  0x15   : > { %v898_v19 = vld [vmem:[%s953_s24 + $0x78] sm:$0xff]  }
  0x1a   : > { %837 = vmatmul.mubr.msk.bf16.gmra.mrb[4].mxu0 %vm318_vm1, %v886_v7 }
  0x1b   : > { %840 = vmatprep.mubr.msk.bf16.mxu0 %vm318_vm1, %v887_v11  ;;  %853 = vmatmul.mubr.msk.bf16.gmra.mrb[4].mxu1 %vm318_vm1, %v894_v12 }
  0x1c   : > { %856 = vmatprep.mubr.msk.bf16.mxu1 %vm318_vm1, %v895_v13 }
  0x22   : > { %841 = vmatmul.mubr.msk.bf16.gmra.mrb[8].mxu0 %vm318_vm1, %v888_v14 }
  0x23   : > { %844 = vmatprep.mubr.msk.bf16.mxu0 %vm318_vm1, %v889_v15  ;;  %857 = vmatmul.mubr.msk.bf16.gmra.mrb[8].mxu1 %vm318_vm1, %v896_v16 }
  0x24   : > { %860 = vmatprep.mubr.msk.bf16.mxu1 %vm318_vm1, %v897_v17 }
  0x2a   : > { %845 = vmatmul.mubr.msk.bf16.gmra.mrb[12].mxu0 %vm318_vm1, %v890_v18 }
  0x2b   : > { %861 = vmatmul.mubr.msk.bf16.gmra.mrb[12].mxu1 %vm318_vm1, %v898_v19 }
  0xe5   : > { %v834_v20 = vpop.f32.mrb[0].mxu0 }
  0xe6   : > { %534 = vst [vmem:[%s991_s28 + $0x10] sm:$0xff] %v834_v20  ;;  %v405_v21 = vpop.f32.mrb[1].mxu0  ;;  %v997_v27 = vpop.f32.mrb[0].mxu1  ;;  %v603_v28 = vmul.f32 %v834_v20, %v834_v20 }
  0xe7   : > { %532 = vst [vmem:[%s991_s28] sm:$0xff] %v405_v21  ;;  %v835_v22 = vpop.f32.mrb[2].mxu0  ;;  %v601_v24 = vmul.f32 %v405_v21, %v405_v21  ;;  %550 = vst [vmem:[%s991_s28 + $0x90] sm:$0xff] %v997_v27  ;;  %v1001_v31 = vpop.f32.mrb[1].mxu1 }
  0xe8   : > { %535 = vst [vmem:[%s991_s28 + $0x18] sm:$0xff] %v835_v22  ;;  %v408_v23 = vpop.f32.mrb[3].mxu0  ;;  %548 = vst [vmem:[%s991_s28 + $0x80] sm:$0xff] %v1001_v31  ;;  %v1005_v32 = vpop.f32.mrb[2].mxu1  ;;  %v604_v33 = vmul.f32 %v835_v22, %v835_v22 }
  0xe9   : > { %533 = vst [vmem:[%s991_s28 + $0x8] sm:$0xff] %v408_v23  ;;  %v564_v25 = vadd.f32 %v408_v23, %v405_v21  ;;  %v602_v26 = vmul.f32 %v408_v23, %v408_v23  ;;  %551 = vst [vmem:[%s991_s28 + $0x98] sm:$0xff] %v1005_v32  ;;  %v1009_v37 = vpop.f32.mrb[3].mxu1 }
  0xea   : > { %549 = vst [vmem:[%s991_s28 + $0x88] sm:$0xff] %v1009_v37 }
  0xeb   : > { %v565_v29 = vadd.f32 %v834_v20, %v564_v25  ;;  %v633_v30 = vadd.f32 %v602_v26, %v601_v24 }
  0xed   : > { %v634_v34 = vadd.f32 %v633_v30, %v603_v28  ;;  %v838_v35 = vpop.f32.mrb[4].mxu0  ;;  %v566_v36 = vadd.f32 %v835_v22, %v565_v29 }
  0xee   : > { %538 = vst [vmem:[%s991_s28 + $0x30] sm:$0xff] %v838_v35  ;;  %v421_v38 = vpop.f32.mrb[5].mxu0  ;;  %v1017_v47 = vpop.f32.mrb[4].mxu1  ;;  %v607_v48 = vmul.f32 %v838_v35, %v838_v35 }
  0xef   : > { %536 = vst [vmem:[%s991_s28 + $0x20] sm:$0xff] %v421_v38  ;;  %v567_v39 = vadd.f32 %v566_v36, %v421_v38  ;;  %v605_v40 = vmul.f32 %v421_v38, %v421_v38  ;;  %v635_v41 = vadd.f32 %v634_v34, %v604_v33  ;;  %v839_v42 = vpop.f32.mrb[6].mxu0  ;;  %554 = vst [vmem:[%s991_s28 + $0xb0] sm:$0xff] %v1017_v47  ;;  %v1021_v51 = vpop.f32.mrb[5].mxu1 }
  0xf0   : > { %539 = vst [vmem:[%s991_s28 + $0x38] sm:$0xff] %v839_v42  ;;  %v424_v43 = vpop.f32.mrb[7].mxu0  ;;  %552 = vst [vmem:[%s991_s28 + $0xa0] sm:$0xff] %v1021_v51  ;;  %v1025_v52 = vpop.f32.mrb[6].mxu1  ;;  %v608_v53 = vmul.f32 %v839_v42, %v839_v42 }
  0xf1   : > { %v636_v44 = vadd.f32 %v635_v41, %v605_v40  ;;  %537 = vst [vmem:[%s991_s28 + $0x28] sm:$0xff] %v424_v43  ;;  %v568_v45 = vadd.f32 %v567_v39, %v424_v43  ;;  %v606_v46 = vmul.f32 %v424_v43, %v424_v43  ;;  %555 = vst [vmem:[%s991_s28 + $0xb8] sm:$0xff] %v1025_v52  ;;  %v1029_v57 = vpop.f32.mrb[7].mxu1 }
  0xf2   : > { %553 = vst [vmem:[%s991_s28 + $0xa8] sm:$0xff] %v1029_v57  ;;  %v619_v43 = vmul.f32 %v997_v27, %v997_v27 }
  0xf3   : > { %v569_v49 = vadd.f32 %v838_v35, %v568_v45  ;;  %v637_v50 = vadd.f32 %v636_v44, %v606_v46  ;;  %v617_v35 = vmul.f32 %v1001_v31, %v1001_v31  ;;  %v620_v46 = vmul.f32 %v1005_v32, %v1005_v32 }
  0xf5   : > { %v638_v54 = vadd.f32 %v637_v50, %v607_v48  ;;  %v842_v55 = vpop.f32.mrb[8].mxu0  ;;  %v570_v56 = vadd.f32 %v839_v42, %v569_v49  ;;  %v618_v42 = vmul.f32 %v1009_v37, %v1009_v37 }
  0xf6   : > { %542 = vst [vmem:[%s991_s28 + $0x50] sm:$0xff] %v842_v55  ;;  %v437_v58 = vpop.f32.mrb[9].mxu0  ;;  %v1037_v3 = vpop.f32.mrb[8].mxu1  ;;  %v611_v4 = vmul.f32 %v842_v55, %v842_v55 }
  0xf7   : > { %540 = vst [vmem:[%s991_s28 + $0x40] sm:$0xff] %v437_v58  ;;  %v571_v59 = vadd.f32 %v570_v56, %v437_v58  ;;  %v609_v60 = vmul.f32 %v437_v58, %v437_v58  ;;  %v639_v61 = vadd.f32 %v638_v54, %v608_v53  ;;  %v843_v62 = vpop.f32.mrb[10].mxu0  ;;  %558 = vst [vmem:[%s991_s28 + $0xd0] sm:$0xff] %v1037_v3  ;;  %v501_v7 = vpop.f32.mrb[9].mxu1 }
  0xf8   : > { %543 = vst [vmem:[%s991_s28 + $0x58] sm:$0xff] %v843_v62  ;;  %v440_v63 = vpop.f32.mrb[11].mxu0  ;;  %556 = vst [vmem:[%s991_s28 + $0xc0] sm:$0xff] %v501_v7  ;;  %v1042_v8 = vpop.f32.mrb[10].mxu1  ;;  %v612_v9 = vmul.f32 %v843_v62, %v843_v62 }
  0xf9   : > { %v640_v0 = vadd.f32 %v639_v61, %v609_v60  ;;  %541 = vst [vmem:[%s991_s28 + $0x48] sm:$0xff] %v440_v63  ;;  %v572_v1 = vadd.f32 %v571_v59, %v440_v63  ;;  %v610_v2 = vmul.f32 %v440_v63, %v440_v63  ;;  %559 = vst [vmem:[%s991_s28 + $0xd8] sm:$0xff] %v1042_v8  ;;  %v504_v13 = vpop.f32.mrb[11].mxu1 }
  0xfa   : > { %557 = vst [vmem:[%s991_s28 + $0xc8] sm:$0xff] %v504_v13 }
  0xfb   : > { %v573_v5 = vadd.f32 %v842_v55, %v572_v1  ;;  %v641_v6 = vadd.f32 %v640_v0, %v610_v2  ;;  %v622_v55 = vmul.f32 %v1029_v57, %v1029_v57  ;;  %v626_v1 = vmul.f32 %v504_v13, %v504_v13 }
  0xfd   : > { %v642_v10 = vadd.f32 %v641_v6, %v611_v4  ;;  %v846_v11 = vpop.f32.mrb[12].mxu0  ;;  %v574_v12 = vadd.f32 %v843_v62, %v573_v5 }
  0xfe   : > { %546 = vst [vmem:[%s991_s28 + $0x70] sm:$0xff] %v846_v11  ;;  %v453_v14 = vpop.f32.mrb[13].mxu0  ;;  %v862_v23 = vpop.f32.mrb[12].mxu1  ;;  %v615_v24 = vmul.f32 %v846_v11, %v846_v11 }
  0xff   : > { %544 = vst [vmem:[%s991_s28 + $0x60] sm:$0xff] %v453_v14  ;;  %v575_v15 = vadd.f32 %v574_v12, %v453_v14  ;;  %v613_v16 = vmul.f32 %v453_v14, %v453_v14  ;;  %v643_v17 = vadd.f32 %v642_v10, %v612_v9  ;;  %v847_v18 = vpop.f32.mrb[14].mxu0  ;;  %562 = vst [vmem:[%s991_s28 + $0xf0] sm:$0xff] %v862_v23  ;;  %v517_v28 = vpop.f32.mrb[13].mxu1 }
 0x100   : > { %547 = vst [vmem:[%s991_s28 + $0x78] sm:$0xff] %v847_v18  ;;  %v456_v19 = vpop.f32.mrb[15].mxu0  ;;  %560 = vst [vmem:[%s991_s28 + $0xe0] sm:$0xff] %v517_v28  ;;  %v863_v29 = vpop.f32.mrb[14].mxu1  ;;  %v616_v30 = vmul.f32 %v847_v18, %v847_v18 }
 0x101   : > { %v644_v20 = vadd.f32 %v643_v17, %v613_v16  ;;  %545 = vst [vmem:[%s991_s28 + $0x68] sm:$0xff] %v456_v19  ;;  %v576_v21 = vadd.f32 %v575_v15, %v456_v19  ;;  %v614_v22 = vmul.f32 %v456_v19, %v456_v19  ;;  %563 = vst [vmem:[%s991_s28 + $0xf8] sm:$0xff] %v863_v29  ;;  %v520_v36 = vpop.f32.mrb[15].mxu1 }
 0x102   : > { %561 = vst [vmem:[%s991_s28 + $0xe8] sm:$0xff] %v520_v36  ;;  %v630_v12 = vmul.f32 %v520_v36, %v520_v36  ;;  %v632_v16 = vmul.f32 %v863_v29, %v863_v29 }
 0x103   : > { %v577_v25 = vadd.f32 %v846_v11, %v576_v21  ;;  %v645_v26 = vadd.f32 %v644_v20, %v614_v22 }
 0x105   : > { %v646_v33 = vadd.f32 %v645_v26, %v615_v24  ;;  %v578_v34 = vadd.f32 %v847_v18, %v577_v25 }
 0x107   : > { %v579_v38 = vadd.f32 %v578_v34, %v1001_v31  ;;  %v647_v39 = vadd.f32 %v646_v33, %v616_v30  ;;  %v621_v31 = vmul.f32 %v1021_v51, %v1021_v51 }
 0x109   : > { %v648_v40 = vadd.f32 %v647_v39, %v617_v35  ;;  %v580_v41 = vadd.f32 %v579_v38, %v1009_v37 }
 0x10b   : > { %v581_v44 = vadd.f32 %v997_v27, %v580_v41  ;;  %v649_v45 = vadd.f32 %v648_v40, %v618_v42  ;;  %v623_v27 = vmul.f32 %v1017_v47, %v1017_v47 }
 0x10d   : > { %v650_v48 = vadd.f32 %v649_v45, %v619_v43  ;;  %v582_v49 = vadd.f32 %v1005_v32, %v581_v44  ;;  %v624_v32 = vmul.f32 %v1025_v52, %v1025_v52 }
 0x10f   : > { %v583_v50 = vadd.f32 %v582_v49, %v1021_v51  ;;  %v651_v53 = vadd.f32 %v650_v48, %v620_v46  ;;  %v625_v51 = vmul.f32 %v501_v7, %v501_v7 }
 0x111   : > { %v652_v54 = vadd.f32 %v651_v53, %v621_v31  ;;  %v584_v37 = vadd.f32 %v583_v50, %v1029_v57  ;;  %v627_v57 = vmul.f32 %v1037_v3, %v1037_v3 }
 0x113   : > { %v585_v56 = vadd.f32 %v1017_v47, %v584_v37  ;;  %v653_v58 = vadd.f32 %v652_v54, %v622_v55  ;;  %v628_v47 = vmul.f32 %v1042_v8, %v1042_v8 }
 0x115   : > { %v654_v59 = vadd.f32 %v653_v58, %v623_v27  ;;  %v586_v60 = vadd.f32 %v1025_v52, %v585_v56  ;;  %v629_v52 = vmul.f32 %v517_v28, %v517_v28 }
 0x117   : > { %v587_v61 = vadd.f32 %v586_v60, %v501_v7  ;;  %v655_v62 = vadd.f32 %v654_v59, %v624_v32 }
 0x119   : > { %v656_v63 = vadd.f32 %v655_v62, %v625_v51  ;;  %v588_v0 = vadd.f32 %v587_v61, %v504_v13  ;;  %v631_v13 = vmul.f32 %v862_v23, %v862_v23 }
 0x11b   : > { %v589_v2 = vadd.f32 %v1037_v3, %v588_v0  ;;  %v657_v4 = vadd.f32 %v656_v63, %v626_v1 }
 0x11d   : > { %v658_v5 = vadd.f32 %v657_v4, %v627_v57  ;;  %v590_v6 = vadd.f32 %v1042_v8, %v589_v2 }
 0x11f   : > { %v591_v9 = vadd.f32 %v590_v6, %v517_v28  ;;  %v659_v7 = vadd.f32 %v658_v5, %v628_v47 }
 0x121   : > { %v660_v10 = vadd.f32 %v659_v7, %v629_v52  ;;  %v592_v11 = vadd.f32 %v591_v9, %v520_v36 }
 0x123   : > { %v593_v14 = vadd.f32 %v862_v23, %v592_v11  ;;  %v661_v15 = vadd.f32 %v660_v10, %v630_v12 }
 0x125   : > { %v594_v3 = vadd.f32 %v863_v29, %v593_v14  ;;  %v662_v17 = vadd.f32 %v661_v15, %v631_v13 }
 0x127   : > { %v595_v18 = vrot.slane %v594_v3, 4  ;;  %v663_v19 = vadd.f32 %v662_v17, %v632_v16 }
 0x129   : > { %v596_v20 = vadd.f32 %v595_v18, %v594_v3  ;;  %v664_v21 = vrot.slane %v663_v19, 4 }
 0x12b   : > { %v597_v22 = vrot.slane %v596_v20, 2  ;;  %v665_v8 = vadd.f32 %v664_v21, %v663_v19 }
 0x12d   : > { %v598_v24 = vadd.f32 %v597_v22, %v596_v20  ;;  %v666_v25 = vrot.slane %v665_v8, 2 }
 0x12f   : > { %v599_v26 = vrot.slane %v598_v24, 1  ;;  %v667_v28 = vadd.f32 %v666_v25, %v665_v8 }
 0x131   : > { %v668_v30 = vrot.slane %v667_v28, 1  ;;  %v600_v23 = vadd.f32 %v599_v26, %v598_v24 }
 0x133   : > { %v669_v29 = vadd.f32 %v668_v30, %v667_v28 }
 0x135   : > { %v671_v33 = vsel %vm670_vm2, %v600_v23, %v669_v29 }
 0x136   : > { %672 = vst [vmem:[%s184_s5] sm:$0x3] %v671_v33 }
 0x137 PF: > { %s14_s12 = sadd.s32 1, %s905_s12  }
 0x138   : > { %p11_p5 = scmp.ge.s32.totalorder %s14_s12, 4  }
 0x13a   :  { %13 = sbr.rel (!%p11_p5) target bundleno = 1 (0x1), region = 70 }

// kernel: double_conv.7
= control target key start
LH: loop header
LB: loop body
LE: loop exit
PB: predicated region body
PF: predicated region fallthrough
CT: control target
= control target key end

     0   :  { %s453_s12 = smov 0   ;;  %s612_s0 = inlined_call_operand.vmem [shape: f32[512,128], index: 0, kind: input, shape index: {}]   ;;  %s613_s1 = inlined_call_operand.vmem [shape: f32[1,128], index: 1, kind: input, shape index: {}]   ;;  %s614_s2 = inlined_call_operand.vmem [shape: f32[1,128], index: 2, kind: input, shape index: {}]   ;;  %s615_s3 = inlined_call_operand.vmem [shape: f32[512,128], index: 3, kind: output, shape index: {}]  }
   0x1 LB: > { %s404_s13 = sadd.s32 4294967295, %s431_s12   ;;  %p408_p0 = scmp.ge.s32.totalorder %s431_s12, 1  ;;  %s431_s12 = sphi %s453_s12, %s13_s12  }
   0x2   : > { %p138_p1 = scmp.lt.s32.totalorder %s431_s12, 3 }
   0x4   : > { %p139_p2 = pnand %p408_p0, %p138_p1 }
   0x5   : > { %s409_s14 = sshll.u32 (!%p139_p2), %s404_s13, 5  ;;  %v464_v0 = vld [vmem:[%s613_s1] ss:$0 sm:$0xff] (!%p139_p2) }
   0x6   : > { %142 = sbr.rel (%p139_p2) target bundleno = 46 (0x2e), region = 32  ;;  %p163_p3 = scmp.lt.s32.totalorder (!%p139_p2), %s409_s14, 63  ;;  %v474_v1 = vld [vmem:[%s614_s2] ss:$0 sm:$0xff] (!%p139_p2) }
   0xd   : > { %s617_s14 = smov (!%p163_p3, %s409_s14), 63 }
   0xe   : > { %s410_s15 = sshll.u32 %s617_s14, 3 }
   0xf   : > { %s469_s20 = scalar_lea.vmem %s612_s0, %s410_s15  ;;  %s497_s25 = scalar_lea.vmem %s615_s3, %s410_s15 }
  0x10   : > { %v174_v2 = vld [vmem:[%s469_s20] sm:$0xff]  ;;  %v175_v3 = vld [vmem:[%s469_s20 + $0x8] sm:$0xff]  ;;  %v176_v4 = vld [vmem:[%s469_s20 + $0x10] sm:$0xff] }
  0x11   : > { %v213_v5 = vmul.f32 %v464_v0, %v174_v2  ;;  %v214_v6 = vmul.f32 %v464_v0, %v175_v3  ;;  %v215_v7 = vmul.f32 %v464_v0, %v176_v4  ;;  %v177_v8 = vld [vmem:[%s469_s20 + $0x18] sm:$0xff]  ;;  %v178_v9 = vld [vmem:[%s469_s20 + $0x20] sm:$0xff]  ;;  %v179_v10 = vld [vmem:[%s469_s20 + $0x28] sm:$0xff] }
  0x12   : > { %v216_v11 = vmul.f32 %v464_v0, %v177_v8  ;;  %v217_v12 = vmul.f32 %v464_v0, %v178_v9  ;;  %v218_v13 = vmul.f32 %v464_v0, %v179_v10  ;;  %v180_v14 = vld [vmem:[%s469_s20 + $0x30] sm:$0xff]  ;;  %v181_v15 = vld [vmem:[%s469_s20 + $0x38] sm:$0xff]  ;;  %v182_v24 = vld [vmem:[%s469_s20 + $0x40] sm:$0xff] }
  0x13   : > { %v252_v16 = vadd.f32 %v474_v1, %v213_v5  ;;  %v253_v17 = vadd.f32 %v474_v1, %v214_v6  ;;  %v254_v18 = vadd.f32 %v474_v1, %v215_v7  ;;  %v219_v19 = vmul.f32 %v464_v0, %v180_v14  ;;  %v183_v25 = vld [vmem:[%s469_s20 + $0x48] sm:$0xff]  ;;  %v184_v26 = vld [vmem:[%s469_s20 + $0x50] sm:$0xff]  ;;  %v185_v31 = vld [vmem:[%s469_s20 + $0x58] sm:$0xff] }
  0x14   : > { %v255_v20 = vadd.f32 %v474_v1, %v216_v11  ;;  %v256_v21 = vadd.f32 %v474_v1, %v217_v12  ;;  %v257_v22 = vadd.f32 %v474_v1, %v218_v13  ;;  %v220_v23 = vmul.f32 %v464_v0, %v181_v15  ;;  %v186_v32 = vld [vmem:[%s469_s20 + $0x60] sm:$0xff]  ;;  %v187_v33 = vld [vmem:[%s469_s20 + $0x68] sm:$0xff]  ;;  %v188_v38 = vld [vmem:[%s469_s20 + $0x70] sm:$0xff] }
  0x15   : > { %v284_v27 = vmax.f32 %v252_v16, 0.0  ;;  %v285_v28 = vmax.f32 %v253_v17, 0.0  ;;  %v286_v29 = vmax.f32 %v254_v18, 0.0  ;;  %v258_v30 = vadd.f32 %v474_v1, %v219_v19  ;;  %v189_v43 = vld [vmem:[%s469_s20 + $0x78] sm:$0xff]  ;;  %v190_v56 = vld [vmem:[%s469_s20 + $0x80] sm:$0xff]  ;;  %v191_v57 = vld [vmem:[%s469_s20 + $0x88] sm:$0xff] }
  0x16   : > { %v287_v34 = vmax.f32 %v255_v20, 0.0  ;;  %v288_v35 = vmax.f32 %v256_v21, 0.0  ;;  %v289_v36 = vmax.f32 %v257_v22, 0.0  ;;  %v259_v37 = vadd.f32 %v474_v1, %v220_v23  ;;  %v192_v58 = vld [vmem:[%s469_s20 + $0x90] sm:$0xff]  ;;  %v193_v63 = vld [vmem:[%s469_s20 + $0x98] sm:$0xff]  ;;  %v194_v2 = vld [vmem:[%s469_s20 + $0xa0] sm:$0xff] }
  0x17   : > { %316 = vst [vmem:[%s497_s25] sm:$0xff] %v284_v27  ;;  %317 = vst [vmem:[%s497_s25 + $0x8] sm:$0xff] %v285_v28  ;;  %v290_v39 = vmax.f32 %v258_v30, 0.0  ;;  %v221_v40 = vmul.f32 %v464_v0, %v182_v24  ;;  %v222_v41 = vmul.f32 %v464_v0, %v183_v25  ;;  %v223_v42 = vmul.f32 %v464_v0, %v184_v26  ;;  %v195_v3 = vld [vmem:[%s469_s20 + $0xa8] sm:$0xff]  ;;  %v196_v8 = vld [vmem:[%s469_s20 + $0xb0] sm:$0xff] }
  0x18   : > { %318 = vst [vmem:[%s497_s25 + $0x10] sm:$0xff] %v286_v29  ;;  %319 = vst [vmem:[%s497_s25 + $0x18] sm:$0xff] %v287_v34  ;;  %v291_v44 = vmax.f32 %v259_v37, 0.0  ;;  %v224_v45 = vmul.f32 %v464_v0, %v185_v31  ;;  %v225_v46 = vmul.f32 %v464_v0, %v186_v32  ;;  %v226_v47 = vmul.f32 %v464_v0, %v187_v33  ;;  %v197_v13 = vld [vmem:[%s469_s20 + $0xb8] sm:$0xff]  ;;  %v198_v26 = vld [vmem:[%s469_s20 + $0xc0] sm:$0xff] }
  0x19   : > { %320 = vst [vmem:[%s497_s25 + $0x20] sm:$0xff] %v288_v35  ;;  %321 = vst [vmem:[%s497_s25 + $0x28] sm:$0xff] %v289_v36  ;;  %v260_v48 = vadd.f32 %v474_v1, %v221_v40  ;;  %v261_v49 = vadd.f32 %v474_v1, %v222_v41  ;;  %v262_v50 = vadd.f32 %v474_v1, %v223_v42  ;;  %v199_v27 = vld [vmem:[%s469_s20 + $0xc8] sm:$0xff]  ;;  %v200_v28 = vld [vmem:[%s469_s20 + $0xd0] sm:$0xff] }
  0x1a   : > { %322 = vst [vmem:[%s497_s25 + $0x30] sm:$0xff] %v290_v39  ;;  %v227_v51 = vmul.f32 %v464_v0, %v188_v38  ;;  %323 = vst [vmem:[%s497_s25 + $0x38] sm:$0xff] %v291_v44  ;;  %v263_v52 = vadd.f32 %v474_v1, %v224_v45  ;;  %v264_v53 = vadd.f32 %v474_v1, %v225_v46  ;;  %v201_v33 = vld [vmem:[%s469_s20 + $0xd8] sm:$0xff]  ;;  %v202_v34 = vld [vmem:[%s469_s20 + $0xe0] sm:$0xff] }
  0x1b   : > { %v265_v54 = vadd.f32 %v474_v1, %v226_v47  ;;  %v228_v55 = vmul.f32 %v464_v0, %v189_v43  ;;  %v292_v59 = vmax.f32 %v260_v48, 0.0  ;;  %v293_v60 = vmax.f32 %v261_v49, 0.0  ;;  %v203_v35 = vld [vmem:[%s469_s20 + $0xe8] sm:$0xff]  ;;  %v204_v40 = vld [vmem:[%s469_s20 + $0xf0] sm:$0xff]  ;;  %v205_v45 = vld [vmem:[%s469_s20 + $0xf8] sm:$0xff] }
  0x1c   : > { %v294_v61 = vmax.f32 %v262_v50, 0.0  ;;  %v266_v62 = vadd.f32 %v474_v1, %v227_v51  ;;  %v295_v4 = vmax.f32 %v263_v52, 0.0  ;;  %v296_v5 = vmax.f32 %v264_v53, 0.0 }
  0x1d   : > { %v297_v6 = vmax.f32 %v265_v54, 0.0  ;;  %v267_v7 = vadd.f32 %v474_v1, %v228_v55  ;;  %324 = vst [vmem:[%s497_s25 + $0x40] sm:$0xff] %v292_v59  ;;  %325 = vst [vmem:[%s497_s25 + $0x48] sm:$0xff] %v293_v60  ;;  %v229_v10 = vmul.f32 %v464_v0, %v190_v56  ;;  %v230_v11 = vmul.f32 %v464_v0, %v191_v57 }
  0x1e   : > { %326 = vst [vmem:[%s497_s25 + $0x50] sm:$0xff] %v294_v61  ;;  %v298_v9 = vmax.f32 %v266_v62, 0.0  ;;  %v231_v12 = vmul.f32 %v464_v0, %v192_v58  ;;  %327 = vst [vmem:[%s497_s25 + $0x58] sm:$0xff] %v295_v4  ;;  %v232_v15 = vmul.f32 %v464_v0, %v193_v63  ;;  %v233_v16 = vmul.f32 %v464_v0, %v194_v2 }
  0x1f   : > { %328 = vst [vmem:[%s497_s25 + $0x60] sm:$0xff] %v296_v5  ;;  %329 = vst [vmem:[%s497_s25 + $0x68] sm:$0xff] %v297_v6  ;;  %v299_v14 = vmax.f32 %v267_v7, 0.0  ;;  %v234_v17 = vmul.f32 %v464_v0, %v195_v3  ;;  %v268_v18 = vadd.f32 %v474_v1, %v229_v10  ;;  %v269_v19 = vadd.f32 %v474_v1, %v230_v11 }
  0x20   : > { %330 = vst [vmem:[%s497_s25 + $0x70] sm:$0xff] %v298_v9  ;;  %v270_v20 = vadd.f32 %v474_v1, %v231_v12  ;;  %v235_v21 = vmul.f32 %v464_v0, %v196_v8  ;;  %v271_v22 = vadd.f32 %v474_v1, %v232_v15  ;;  %v272_v23 = vadd.f32 %v474_v1, %v233_v16 }
  0x21   : > { %331 = vst [vmem:[%s497_s25 + $0x78] sm:$0xff] %v299_v14  ;;  %v273_v24 = vadd.f32 %v474_v1, %v234_v17  ;;  %v236_v25 = vmul.f32 %v464_v0, %v197_v13  ;;  %v300_v29 = vmax.f32 %v268_v18, 0.0  ;;  %v301_v30 = vmax.f32 %v269_v19, 0.0 }
  0x22   : > { %v302_v31 = vmax.f32 %v270_v20, 0.0  ;;  %v274_v32 = vadd.f32 %v474_v1, %v235_v21  ;;  %v303_v36 = vmax.f32 %v271_v22, 0.0  ;;  %v304_v37 = vmax.f32 %v272_v23, 0.0 }
  0x23   : > { %v305_v38 = vmax.f32 %v273_v24, 0.0  ;;  %v275_v39 = vadd.f32 %v474_v1, %v236_v25  ;;  %332 = vst [vmem:[%s497_s25 + $0x80] sm:$0xff] %v300_v29  ;;  %333 = vst [vmem:[%s497_s25 + $0x88] sm:$0xff] %v301_v30  ;;  %v237_v42 = vmul.f32 %v464_v0, %v198_v26  ;;  %v238_v43 = vmul.f32 %v464_v0, %v199_v27 }
  0x24   : > { %334 = vst [vmem:[%s497_s25 + $0x90] sm:$0xff] %v302_v31  ;;  %v306_v41 = vmax.f32 %v274_v32, 0.0  ;;  %v239_v44 = vmul.f32 %v464_v0, %v200_v28  ;;  %335 = vst [vmem:[%s497_s25 + $0x98] sm:$0xff] %v303_v36  ;;  %v240_v47 = vmul.f32 %v464_v0, %v201_v33  ;;  %v241_v48 = vmul.f32 %v464_v0, %v202_v34 }
  0x25   : > { %336 = vst [vmem:[%s497_s25 + $0xa0] sm:$0xff] %v304_v37  ;;  %337 = vst [vmem:[%s497_s25 + $0xa8] sm:$0xff] %v305_v38  ;;  %v307_v46 = vmax.f32 %v275_v39, 0.0  ;;  %v242_v49 = vmul.f32 %v464_v0, %v203_v35  ;;  %v276_v50 = vadd.f32 %v474_v1, %v237_v42  ;;  %v277_v51 = vadd.f32 %v474_v1, %v238_v43 }
  0x26   : > { %338 = vst [vmem:[%s497_s25 + $0xb0] sm:$0xff] %v306_v41  ;;  %v278_v52 = vadd.f32 %v474_v1, %v239_v44  ;;  %v243_v53 = vmul.f32 %v464_v0, %v204_v40  ;;  %v279_v54 = vadd.f32 %v474_v1, %v240_v47  ;;  %v280_v55 = vadd.f32 %v474_v1, %v241_v48 }
  0x27   : > { %339 = vst [vmem:[%s497_s25 + $0xb8] sm:$0xff] %v307_v46  ;;  %v281_v56 = vadd.f32 %v474_v1, %v242_v49  ;;  %v244_v57 = vmul.f32 %v464_v0, %v205_v45  ;;  %v308_v58 = vmax.f32 %v276_v50, 0.0  ;;  %v309_v59 = vmax.f32 %v277_v51, 0.0 }
  0x28   : > { %v310_v60 = vmax.f32 %v278_v52, 0.0  ;;  %v282_v61 = vadd.f32 %v474_v1, %v243_v53  ;;  %v311_v62 = vmax.f32 %v279_v54, 0.0  ;;  %v312_v63 = vmax.f32 %v280_v55, 0.0 }
  0x29   : > { %v313_v2 = vmax.f32 %v281_v56, 0.0  ;;  %v283_v3 = vadd.f32 %v474_v1, %v244_v57  ;;  %340 = vst [vmem:[%s497_s25 + $0xc0] sm:$0xff] %v308_v58  ;;  %341 = vst [vmem:[%s497_s25 + $0xc8] sm:$0xff] %v309_v59 }
  0x2a   : > { %342 = vst [vmem:[%s497_s25 + $0xd0] sm:$0xff] %v310_v60  ;;  %v314_v4 = vmax.f32 %v282_v61, 0.0  ;;  %343 = vst [vmem:[%s497_s25 + $0xd8] sm:$0xff] %v311_v62 }
  0x2b   : > { %344 = vst [vmem:[%s497_s25 + $0xe0] sm:$0xff] %v312_v63  ;;  %345 = vst [vmem:[%s497_s25 + $0xe8] sm:$0xff] %v313_v2  ;;  %v315_v0 = vmax.f32 %v283_v3, 0.0 }
  0x2c   : > { %346 = vst [vmem:[%s497_s25 + $0xf0] sm:$0xff] %v314_v4 }
  0x2d   : > { %347 = vst [vmem:[%s497_s25 + $0xf8] sm:$0xff] %v315_v0 }
  0x2e PF: > { %s13_s12 = sadd.s32 1, %s431_s12  }
  0x2f   : > { %p10_p4 = scmp.ge.s32.totalorder %s13_s12, 4  }
  0x31   :  { %12 = sbr.rel (!%p10_p4) target bundleno = 1 (0x1), region = 62 }

// kernel: double_conv.6
= control target key start
LH: loop header
LB: loop body
LE: loop exit
PB: predicated region body
PF: predicated region fallthrough
CT: control target
= control target key end

     0   :  { %s957_s12 = smov 0   ;;  %s1147_s0 = inlined_call_operand.vmem [shape: bf16[512,72], index: 0, kind: input, shape index: {}]   ;;  %s1148_s1 = inlined_call_operand.vmem [shape: bf16[72,128], index: 1, kind: input, shape index: {}]   ;;  %s1149_s2 = inlined_call_operand.vmem [shape: f32[512,128], index: 2, kind: output, shape index: {0}]   ;;  %s1150_s3 = inlined_call_operand.vmem [shape: f32[2,2,128], index: 3, kind: output, shape index: {1}]  }
   0x1 LB: > { %s963_s13 = sadd.s32 4294967295, %s935_s12   ;;  %p780_p0 = scmp.ge.s32.totalorder %s935_s12, 1  ;;  %s935_s12 = sphi %s957_s12, %s14_s12  }
   0x2   : > { %p141_p1 = scmp.lt.s32.totalorder %s935_s12, 3 }
   0x4   : > { %p142_p2 = pnand %p780_p0, %p141_p1 }
   0x5   : > { %v908_v0 = vld [vmem:[%s1148_s1] sm:$0xff] (!%p142_p2)   ;;  %v909_v1 = vld [vmem:[%s1148_s1 + $0x8] sm:$0xff] (!%p142_p2)   ;;  %s781_s18 = sshll.u32 (!%p142_p2), %s963_s13, 5  ;;  %v910_v2 = vld [vmem:[%s1148_s1 + $0x10] sm:$0xff] (!%p142_p2)   ;;  %vm334_vm0 = vcmask (!%p142_p2), 588800   ;;  %vm383_vm1 = vcmask (!%p142_p2), 1043456  }
   0x6   : > { %145 = sbr.rel (%p142_p2) target bundleno = 319 (0x13f), region = 28  ;;  %846 = vmatprep.subr.bf16.mxu0 (!%p142_p2), %v908_v0  ;;  %p170_p3 = scmp.lt.s32.totalorder (!%p142_p2), %s781_s18, 63  ;;  %888 = vmatprep.subr.bf16.mxu1 (!%p142_p2), %v908_v0  ;;  %v911_v3 = vld [vmem:[%s1148_s1 + $0x18] sm:$0xff] (!%p142_p2)   ;;  %v912_v5 = vld [vmem:[%s1148_s1 + $0x20] ss:$0 sps:$4 sm:$0xff] (!%p142_p2)   ;;  %vm686_vm2 = vcmask (!%p142_p2), 1040384  }
   0x7   : > { %847 = vmatpush3.bf16.msra.mxu0 (!%p142_p2), %v908_v0  ;;  %893 = vmatpush3.bf16.msra.mxu1 (!%p142_p2), %v908_v0  ;;  %v385_v6 = vsel (!%p142_p2), %vm383_vm1, %v912_v5, 0  ;;  %p181_p4 = scmp.lt.s32.totalorder (!%p142_p2), %s963_s13, 1 }
   0x8   : > { %848 = vmatprep.subr.bf16.mxu0 (!%p142_p2), %v909_v1  ;;  %889 = vmatprep.subr.bf16.mxu1 (!%p142_p2), %v909_v1 }
   0xb   : > { %849 = vmatpush3.bf16.msra.mxu0 (!%p142_p2), %v909_v1  ;;  %894 = vmatpush3.bf16.msra.mxu1 (!%p142_p2), %v909_v1 }
   0xc   : > { %850 = vmatprep.subr.bf16.mxu0 (!%p142_p2), %v910_v2  ;;  %890 = vmatprep.subr.bf16.mxu1 (!%p142_p2), %v910_v2 }
   0xd   : > { %s1152_s18 = smov (!%p170_p3, %s781_s18), 63  ;;  %s1154_s13 = smov (!%p181_p4, %s963_s13), 1 }
   0xe   : > { %s782_s21 = sshll.u32 %s1152_s18, 2  ;;  %s784_s29 = sshll.u32 %s1152_s18, 3 }
   0xf   : > { %s986_s26 = scalar_lea.vmem %s1147_s0, %s782_s21  ;;  %851 = vmatpush3.bf16.msra.mxu0 %v910_v2  ;;  %895 = vmatpush3.bf16.msra.mxu1 %v910_v2  ;;  %s1027_s5 = scalar_lea.vmem %s1149_s2, %s784_s29 }
  0x10   : > { %v913_v4 = vld [vmem:[%s986_s26] sm:$0xff]   ;;  %852 = vmatprep.subr.bf16.mxu0 %v911_v3  ;;  %891 = vmatprep.subr.bf16.mxu1 %v911_v3  ;;  %v914_v7 = vld [vmem:[%s986_s26 + $0x8] sm:$0xff]   ;;  %v915_v9 = vld [vmem:[%s986_s26 + $0x10] sm:$0xff]   ;;  %s785_s6 = sshll.u32 %s1154_s13, 1 }
  0x11   : > { %856 = vmatprep.mubr.msk.bf16.mxu0 %vm334_vm0, %v913_v4  ;;  %v921_v8 = vld [vmem:[%s986_s26 + $0x40] sm:$0xff]   ;;  %v922_v10 = vld [vmem:[%s986_s26 + $0x48] sm:$0xff]   ;;  %v923_v11 = vld [vmem:[%s986_s26 + $0x50] sm:$0xff]   ;;  %s184_s9 = scalar_lea.vmem %s1150_s3, %s785_s6 }
  0x12   : > { %872 = vmatprep.mubr.msk.bf16.mxu1 %vm334_vm0, %v921_v8  ;;  %v916_v12 = vld [vmem:[%s986_s26 + $0x18] sm:$0xff]   ;;  %v917_v14 = vld [vmem:[%s986_s26 + $0x20] sm:$0xff]   ;;  %v918_v16 = vld [vmem:[%s986_s26 + $0x28] sm:$0xff]  }
  0x13   : > { %853 = vmatpush3.bf16.msra.mxu0 %v911_v3  ;;  %896 = vmatpush3.bf16.msra.mxu1 %v911_v3  ;;  %v924_v13 = vld [vmem:[%s986_s26 + $0x58] sm:$0xff]   ;;  %v925_v15 = vld [vmem:[%s986_s26 + $0x60] sm:$0xff]   ;;  %v926_v17 = vld [vmem:[%s986_s26 + $0x68] sm:$0xff]  }
  0x14   : > { %898 = vmatprep.subr.msk.bf16.mxu0 %vm383_vm1, %v912_v5  ;;  %899 = vmatprep.subr.msk.bf16.mxu1 %vm383_vm1, %v912_v5  ;;  %v919_v18 = vld [vmem:[%s986_s26 + $0x30] sm:$0xff]   ;;  %v920_v20 = vld [vmem:[%s986_s26 + $0x38] sm:$0xff]  }
  0x15   : > { %v927_v19 = vld [vmem:[%s986_s26 + $0x70] sm:$0xff]   ;;  %v928_v21 = vld [vmem:[%s986_s26 + $0x78] sm:$0xff]  }
  0x17   : > { %855 = vmatpush3.bf16.msra.mxu0 %v385_v6  ;;  %897 = vmatpush3.bf16.msra.mxu1 %v385_v6 }
  0x1a   : > { %857 = vmatmul.mubr.msk.bf16.vlgmr.msra.gmra.mrb[0].mxu0 %vm334_vm0, %v914_v7  ;;  %873 = vmatmul.mubr.msk.bf16.vlgmr.msra.gmra.mrb[0].mxu1 %vm334_vm0, %v922_v10 }
  0x1b   : > { %860 = vmatprep.mubr.msk.bf16.mxu0 %vm334_vm0, %v915_v9  ;;  %876 = vmatprep.mubr.msk.bf16.mxu1 %vm334_vm0, %v923_v11 }
  0x22   : > { %861 = vmatmul.mubr.msk.bf16.gmra.mrb[4].mxu0 %vm334_vm0, %v916_v12  ;;  %877 = vmatmul.mubr.msk.bf16.gmra.mrb[4].mxu1 %vm334_vm0, %v924_v13 }
  0x23   : > { %864 = vmatprep.mubr.msk.bf16.mxu0 %vm334_vm0, %v917_v14  ;;  %880 = vmatprep.mubr.msk.bf16.mxu1 %vm334_vm0, %v925_v15 }
  0x2a   : > { %865 = vmatmul.mubr.msk.bf16.gmra.mrb[8].mxu0 %vm334_vm0, %v918_v16  ;;  %881 = vmatmul.mubr.msk.bf16.gmra.mrb[8].mxu1 %vm334_vm0, %v926_v17 }
  0x2b   : > { %868 = vmatprep.mubr.msk.bf16.mxu0 %vm334_vm0, %v919_v18  ;;  %884 = vmatprep.mubr.msk.bf16.mxu1 %vm334_vm0, %v927_v19 }
  0x32   : > { %869 = vmatmul.mubr.msk.bf16.gmra.mrb[12].mxu0 %vm334_vm0, %v920_v20  ;;  %885 = vmatmul.mubr.msk.bf16.gmra.mrb[12].mxu1 %vm334_vm0, %v928_v21 }
  0xed   : > { %v858_v22 = vpop.f32.mrb[0].mxu0  ;;  %v1029_v23 = vpop.f32.mrb[0].mxu1 }
  0xee   : > { %550 = vst [vmem:[%s1027_s5 + $0x10] sm:$0xff] %v858_v22  ;;  %v421_v24 = vpop.f32.mrb[1].mxu0  ;;  %566 = vst [vmem:[%s1027_s5 + $0x90] sm:$0xff] %v1029_v23  ;;  %v1034_v25 = vpop.f32.mrb[1].mxu1  ;;  %v619_v33 = vmul.f32 %v858_v22, %v858_v22 }
  0xef   : > { %548 = vst [vmem:[%s1027_s5] sm:$0xff] %v421_v24  ;;  %v859_v26 = vpop.f32.mrb[2].mxu0  ;;  %564 = vst [vmem:[%s1027_s5 + $0x80] sm:$0xff] %v1034_v25  ;;  %v1039_v27 = vpop.f32.mrb[2].mxu1  ;;  %v617_v30 = vmul.f32 %v421_v24, %v421_v24 }
  0xf0   : > { %551 = vst [vmem:[%s1027_s5 + $0x18] sm:$0xff] %v859_v26  ;;  %v424_v28 = vpop.f32.mrb[3].mxu0  ;;  %567 = vst [vmem:[%s1027_s5 + $0x98] sm:$0xff] %v1039_v27  ;;  %v1044_v29 = vpop.f32.mrb[3].mxu1  ;;  %v620_v36 = vmul.f32 %v859_v26, %v859_v26 }
  0xf1   : > { %549 = vst [vmem:[%s1027_s5 + $0x8] sm:$0xff] %v424_v28  ;;  %v580_v31 = vadd.f32 %v424_v28, %v421_v24  ;;  %v618_v32 = vmul.f32 %v424_v28, %v424_v28  ;;  %565 = vst [vmem:[%s1027_s5 + $0x88] sm:$0xff] %v1044_v29 }
  0xf3   : > { %v581_v34 = vadd.f32 %v858_v22, %v580_v31  ;;  %v649_v35 = vadd.f32 %v618_v32, %v617_v30 }
  0xf5   : > { %v650_v37 = vadd.f32 %v649_v35, %v619_v33  ;;  %v862_v38 = vpop.f32.mrb[4].mxu0  ;;  %v582_v39 = vadd.f32 %v859_v26, %v581_v34  ;;  %v1049_v40 = vpop.f32.mrb[4].mxu1 }
  0xf6   : > { %554 = vst [vmem:[%s1027_s5 + $0x30] sm:$0xff] %v862_v38  ;;  %v437_v41 = vpop.f32.mrb[5].mxu0  ;;  %570 = vst [vmem:[%s1027_s5 + $0xb0] sm:$0xff] %v1049_v40  ;;  %v1054_v42 = vpop.f32.mrb[5].mxu1  ;;  %v623_v53 = vmul.f32 %v862_v38, %v862_v38 }
  0xf7   : > { %552 = vst [vmem:[%s1027_s5 + $0x20] sm:$0xff] %v437_v41  ;;  %v583_v43 = vadd.f32 %v582_v39, %v437_v41  ;;  %v621_v44 = vmul.f32 %v437_v41, %v437_v41  ;;  %v651_v45 = vadd.f32 %v650_v37, %v620_v36  ;;  %v863_v46 = vpop.f32.mrb[6].mxu0  ;;  %568 = vst [vmem:[%s1027_s5 + $0xa0] sm:$0xff] %v1054_v42  ;;  %v1059_v47 = vpop.f32.mrb[6].mxu1 }
  0xf8   : > { %555 = vst [vmem:[%s1027_s5 + $0x38] sm:$0xff] %v863_v46  ;;  %v440_v48 = vpop.f32.mrb[7].mxu0  ;;  %571 = vst [vmem:[%s1027_s5 + $0xb8] sm:$0xff] %v1059_v47  ;;  %v1064_v49 = vpop.f32.mrb[7].mxu1  ;;  %v624_v56 = vmul.f32 %v863_v46, %v863_v46  ;;  %v633_v39 = vmul.f32 %v1034_v25, %v1034_v25 }
  0xf9   : > { %v652_v50 = vadd.f32 %v651_v45, %v621_v44  ;;  %553 = vst [vmem:[%s1027_s5 + $0x28] sm:$0xff] %v440_v48  ;;  %v584_v51 = vadd.f32 %v583_v43, %v440_v48  ;;  %v622_v52 = vmul.f32 %v440_v48, %v440_v48  ;;  %569 = vst [vmem:[%s1027_s5 + $0xa8] sm:$0xff] %v1064_v49 }
  0xfa   : > { %v635_v48 = vmul.f32 %v1029_v23, %v1029_v23 }
  0xfb   : > { %v585_v54 = vadd.f32 %v862_v38, %v584_v51  ;;  %v653_v55 = vadd.f32 %v652_v50, %v622_v52  ;;  %v636_v52 = vmul.f32 %v1039_v27, %v1039_v27 }
  0xfd   : > { %v654_v57 = vadd.f32 %v653_v55, %v623_v53  ;;  %v866_v58 = vpop.f32.mrb[8].mxu0  ;;  %v586_v59 = vadd.f32 %v863_v46, %v585_v54  ;;  %v1069_v60 = vpop.f32.mrb[8].mxu1  ;;  %v634_v46 = vmul.f32 %v1044_v29, %v1044_v29 }
  0xfe   : > { %558 = vst [vmem:[%s1027_s5 + $0x50] sm:$0xff] %v866_v58  ;;  %v453_v61 = vpop.f32.mrb[9].mxu0  ;;  %574 = vst [vmem:[%s1027_s5 + $0xd0] sm:$0xff] %v1069_v60  ;;  %v1074_v62 = vpop.f32.mrb[9].mxu1  ;;  %v627_v9 = vmul.f32 %v866_v58, %v866_v58 }
  0xff   : > { %556 = vst [vmem:[%s1027_s5 + $0x40] sm:$0xff] %v453_v61  ;;  %v587_v63 = vadd.f32 %v586_v59, %v453_v61  ;;  %v625_v0 = vmul.f32 %v453_v61, %v453_v61  ;;  %v655_v1 = vadd.f32 %v654_v57, %v624_v56  ;;  %v867_v2 = vpop.f32.mrb[10].mxu0  ;;  %572 = vst [vmem:[%s1027_s5 + $0xc0] sm:$0xff] %v1074_v62  ;;  %v1079_v3 = vpop.f32.mrb[10].mxu1 }
 0x100   : > { %559 = vst [vmem:[%s1027_s5 + $0x58] sm:$0xff] %v867_v2  ;;  %v456_v4 = vpop.f32.mrb[11].mxu0  ;;  %575 = vst [vmem:[%s1027_s5 + $0xd8] sm:$0xff] %v1079_v3  ;;  %v1084_v5 = vpop.f32.mrb[11].mxu1  ;;  %v628_v12 = vmul.f32 %v867_v2, %v867_v2 }
 0x101   : > { %v656_v6 = vadd.f32 %v655_v1, %v625_v0  ;;  %557 = vst [vmem:[%s1027_s5 + $0x48] sm:$0xff] %v456_v4  ;;  %v588_v7 = vadd.f32 %v587_v63, %v456_v4  ;;  %v626_v8 = vmul.f32 %v456_v4, %v456_v4  ;;  %573 = vst [vmem:[%s1027_s5 + $0xc8] sm:$0xff] %v1084_v5 }
 0x103   : > { %v589_v10 = vadd.f32 %v866_v58, %v588_v7  ;;  %v657_v11 = vadd.f32 %v656_v6, %v626_v8  ;;  %v638_v58 = vmul.f32 %v1064_v49, %v1064_v49  ;;  %v642_v6 = vmul.f32 %v1084_v5, %v1084_v5 }
 0x105   : > { %v658_v13 = vadd.f32 %v657_v11, %v627_v9  ;;  %v870_v14 = vpop.f32.mrb[12].mxu0  ;;  %v590_v15 = vadd.f32 %v867_v2, %v589_v10  ;;  %v1089_v16 = vpop.f32.mrb[12].mxu1 }
 0x106   : > { %562 = vst [vmem:[%s1027_s5 + $0x70] sm:$0xff] %v870_v14  ;;  %v469_v17 = vpop.f32.mrb[13].mxu0  ;;  %578 = vst [vmem:[%s1027_s5 + $0xf0] sm:$0xff] %v1089_v16  ;;  %v533_v18 = vpop.f32.mrb[13].mxu1  ;;  %v631_v33 = vmul.f32 %v870_v14, %v870_v14 }
 0x107   : > { %560 = vst [vmem:[%s1027_s5 + $0x60] sm:$0xff] %v469_v17  ;;  %v591_v19 = vadd.f32 %v590_v15, %v469_v17  ;;  %v629_v20 = vmul.f32 %v469_v17, %v469_v17  ;;  %v659_v21 = vadd.f32 %v658_v13, %v628_v12  ;;  %v871_v22 = vpop.f32.mrb[14].mxu0  ;;  %576 = vst [vmem:[%s1027_s5 + $0xe0] sm:$0xff] %v533_v18  ;;  %v887_v24 = vpop.f32.mrb[14].mxu1 }
 0x108   : > { %563 = vst [vmem:[%s1027_s5 + $0x78] sm:$0xff] %v871_v22  ;;  %v472_v26 = vpop.f32.mrb[15].mxu0  ;;  %579 = vst [vmem:[%s1027_s5 + $0xf8] sm:$0xff] %v887_v24  ;;  %v536_v28 = vpop.f32.mrb[15].mxu1  ;;  %v632_v36 = vmul.f32 %v871_v22, %v871_v22  ;;  %v645_v10 = vmul.f32 %v533_v18, %v533_v18  ;;  %v647_v15 = vmul.f32 %v1089_v16, %v1089_v16 }
 0x109   : > { %v660_v30 = vadd.f32 %v659_v21, %v629_v20  ;;  %561 = vst [vmem:[%s1027_s5 + $0x68] sm:$0xff] %v472_v26  ;;  %v592_v31 = vadd.f32 %v591_v19, %v472_v26  ;;  %v630_v32 = vmul.f32 %v472_v26, %v472_v26  ;;  %577 = vst [vmem:[%s1027_s5 + $0xe8] sm:$0xff] %v536_v28 }
 0x10a   : > { %v648_v19 = vmul.f32 %v887_v24, %v887_v24 }
 0x10b   : > { %v593_v34 = vadd.f32 %v870_v14, %v592_v31  ;;  %v661_v35 = vadd.f32 %v660_v30, %v630_v32 }
 0x10d   : > { %v662_v37 = vadd.f32 %v661_v35, %v631_v33  ;;  %v594_v38 = vadd.f32 %v871_v22, %v593_v34 }
 0x10f   : > { %v595_v41 = vadd.f32 %v594_v38, %v1034_v25  ;;  %v663_v43 = vadd.f32 %v662_v37, %v632_v36  ;;  %v637_v25 = vmul.f32 %v1054_v42, %v1054_v42 }
 0x111   : > { %v664_v44 = vadd.f32 %v663_v43, %v633_v39  ;;  %v596_v45 = vadd.f32 %v595_v41, %v1044_v29 }
 0x113   : > { %v597_v50 = vadd.f32 %v1029_v23, %v596_v45  ;;  %v665_v51 = vadd.f32 %v664_v44, %v634_v46  ;;  %v639_v23 = vmul.f32 %v1049_v40, %v1049_v40 }
 0x115   : > { %v666_v53 = vadd.f32 %v665_v51, %v635_v48  ;;  %v598_v54 = vadd.f32 %v1039_v27, %v597_v50  ;;  %v640_v27 = vmul.f32 %v1059_v47, %v1059_v47 }
 0x117   : > { %v599_v55 = vadd.f32 %v598_v54, %v1054_v42  ;;  %v667_v56 = vadd.f32 %v666_v53, %v636_v52  ;;  %v641_v42 = vmul.f32 %v1074_v62, %v1074_v62 }
 0x119   : > { %v668_v57 = vadd.f32 %v667_v56, %v637_v25  ;;  %v600_v29 = vadd.f32 %v599_v55, %v1064_v49 }
 0x11b   : > { %v601_v59 = vadd.f32 %v1049_v40, %v600_v29  ;;  %v669_v61 = vadd.f32 %v668_v57, %v638_v58  ;;  %v643_v40 = vmul.f32 %v1069_v60, %v1069_v60 }
 0x11d   : > { %v670_v63 = vadd.f32 %v669_v61, %v639_v23  ;;  %v602_v0 = vadd.f32 %v1059_v47, %v601_v59  ;;  %v644_v47 = vmul.f32 %v1079_v3, %v1079_v3 }
 0x11f   : > { %v603_v1 = vadd.f32 %v602_v0, %v1074_v62  ;;  %v671_v2 = vadd.f32 %v670_v63, %v640_v27 }
 0x121   : > { %v672_v4 = vadd.f32 %v671_v2, %v641_v42  ;;  %v604_v49 = vadd.f32 %v603_v1, %v1084_v5  ;;  %v646_v5 = vmul.f32 %v536_v28, %v536_v28 }
 0x123   : > { %v605_v7 = vadd.f32 %v1069_v60, %v604_v49  ;;  %v673_v8 = vadd.f32 %v672_v4, %v642_v6 }
 0x125   : > { %v674_v9 = vadd.f32 %v673_v8, %v643_v40  ;;  %v606_v62 = vadd.f32 %v1079_v3, %v605_v7 }
 0x127   : > { %v607_v11 = vadd.f32 %v606_v62, %v533_v18  ;;  %v675_v12 = vadd.f32 %v674_v9, %v644_v47 }
 0x129   : > { %v676_v13 = vadd.f32 %v675_v12, %v645_v10  ;;  %v608_v14 = vadd.f32 %v607_v11, %v536_v28 }
 0x12b   : > { %v609_v60 = vadd.f32 %v1089_v16, %v608_v14  ;;  %v677_v17 = vadd.f32 %v676_v13, %v646_v5 }
 0x12d   : > { %v610_v20 = vadd.f32 %v887_v24, %v609_v60  ;;  %v678_v21 = vadd.f32 %v677_v17, %v647_v15 }
 0x12f   : > { %v611_v22 = vrot.slane %v610_v20, 4  ;;  %v679_v26 = vadd.f32 %v678_v21, %v648_v19 }
 0x131   : > { %v612_v3 = vadd.f32 %v611_v22, %v610_v20  ;;  %v680_v30 = vrot.slane %v679_v26, 4 }
 0x133   : > { %v613_v18 = vrot.slane %v612_v3, 2  ;;  %v681_v31 = vadd.f32 %v680_v30, %v679_v26 }
 0x135   : > { %v614_v32 = vadd.f32 %v613_v18, %v612_v3  ;;  %v682_v33 = vrot.slane %v681_v31, 2 }
 0x137   : > { %v615_v28 = vrot.slane %v614_v32, 1  ;;  %v683_v34 = vadd.f32 %v682_v33, %v681_v31 }
 0x139   : > { %v684_v35 = vrot.slane %v683_v34, 1  ;;  %v616_v16 = vadd.f32 %v615_v28, %v614_v32 }
 0x13b   : > { %v685_v24 = vadd.f32 %v684_v35, %v683_v34 }
 0x13d   : > { %v687_v36 = vsel %vm686_vm2, %v616_v16, %v685_v24 }
 0x13e   : > { %688 = vst [vmem:[%s184_s9] sm:$0x3] %v687_v36 }
 0x13f PF: > { %s14_s12 = sadd.s32 1, %s935_s12  }
 0x140   : > { %p11_p5 = scmp.ge.s32.totalorder %s14_s12, 4  }
 0x142   :  { %13 = sbr.rel (!%p11_p5) target bundleno = 1 (0x1), region = 70 }

</bundles_post_ra>
